<compile_context>
chip_gen: v7x
topology: tpu7x:2x2x1
jax: 0.10.0
libtpu: 0.0.40
codegen_flags: <defaults>
</compile_context>

<pallas_src>
import functools

import jax
import jax.numpy as jnp
from jax import lax
from jax.experimental import pallas as pl
from jax.experimental.pallas import tpu as pltpu


MARG = 128  # lane-aligned halo margin on each side of the flattened spatial axis


# ---------------------------------------------------------------------------
# The fused kernel: one image per grid step
# ---------------------------------------------------------------------------
def _inconv_kernel(x_ref, whead_ref, thead_ref, w2b_ref, w3b_ref, w4_ref,
                   ttail_ref, mask_ref,
                   out_ref,
                   hpad2_ref, hpad3_ref, xpad_ref,
                   *, Cin, Cm, Co2, Hp, Wp):
    FLAT = Hp * Wp

    # Scratch persists across grid steps; the halo margins only influence
    # border lanes that the wrapper discards, but zero them once so the raw
    # kernel output is deterministic.  The interior is rewritten every step.
    @pl.when(pl.program_id(0) == 0)
    def _init():
        hpad2_ref[...] = jnp.zeros_like(hpad2_ref)
        hpad3_ref[...] = jnp.zeros_like(hpad3_ref)
        xpad_ref[...] = jnp.zeros_like(xpad_ref)

    xb = x_ref[0]                    # (Cin, FLAT)  zero-padded-by-2, flattened
    m_int = mask_ref[0:1, :]         # (1, FLAT) 1.0 on the original HxW image
    m_r1 = mask_ref[1:2, :]          # (1, FLAT) 1.0 everywhere but the outer ring

    # ---- fused first-layer 1x1 convs (BN scale already folded into weights) -
    head = jnp.dot(whead_ref[...], xb,
                   preferred_element_type=jnp.float32) + thead_ref[...]

    # ---- branch 1: 1x1 -> BN -> ReLU ----------------------------------------
    acc = jnp.maximum(head[0:Co2, :], 0.0)

    # ---- branch 2: (1x1 -> BN -> ReLU) -> 3x3 pad1 -> BN -> ReLU -------------
    h2 = jnp.maximum(head[Co2:Co2 + Cm, :], 0.0) * m_int   # zero outside image
    hpad2_ref[:, MARG:MARG + FLAT] = h2                    # lane-aligned store
    y2 = jnp.broadcast_to(ttail_ref[0], (Co2, FLAT))       # init acc with shift
    for kh in range(3):
        taps = jnp.concatenate(
            [hpad2_ref[:, MARG + (kh - 1) * Wp + (kw - 1):
                          MARG + (kh - 1) * Wp + (kw - 1) + FLAT]
             for kw in range(3)], axis=0)                  # (3*Cm, FLAT)
        y2 = y2 + jnp.dot(w2b_ref[kh], taps,
                          preferred_element_type=jnp.float32)
    acc = acc + jnp.maximum(y2, 0.0)

    # ---- branch 3: (1x1 pad1 -> BN -> ReLU) -> 5x5 pad1 -> BN -> ReLU --------
    # The 1x1-with-padding head produces relu(shift) on its border ring, which
    # is exactly head(zero input); only the outermost ring (the 5x5 conv's own
    # zero padding) must be forced to zero -> mask with m_r1.
    h3 = jnp.maximum(head[Co2 + Cm:Co2 + 2 * Cm, :], 0.0) * m_r1
    hpad3_ref[:, MARG:MARG + FLAT] = h3
    y3 = jnp.broadcast_to(ttail_ref[1], (Co2, FLAT))
    for kh in range(5):
        taps = jnp.concatenate(
            [hpad3_ref[:, MARG + (kh - 2) * Wp + (kw - 2):
                          MARG + (kh - 2) * Wp + (kw - 2) + FLAT]
             for kw in range(5)], axis=0)                  # (5*Cm, FLAT)
        y3 = y3 + jnp.dot(w3b_ref[kh], taps,
                          preferred_element_type=jnp.float32)
    acc = acc + jnp.maximum(y3, 0.0)

    # ---- branch 4: MaxPool3x3(s=1, p=1, -inf pad) -> 1x1 -> BN -> ReLU -------
    xm = jnp.where(m_int != 0.0, xb, -jnp.inf)             # PyTorch -inf padding
    xpad_ref[:, MARG:MARG + FLAT] = xm
    pooled = xm                                            # center tap
    for kh in range(3):
        for kw in range(3):
            if kh == 1 and kw == 1:
                continue
            off = MARG + (kh - 1) * Wp + (kw - 1)
            pooled = jnp.maximum(pooled, xpad_ref[:, off:off + FLAT])
    pooled = jnp.where(m_int != 0.0, pooled, 0.0)          # keep garbage lanes finite
    y4 = jnp.dot(w4_ref[...], pooled,
                 preferred_element_type=jnp.float32) + ttail_ref[2]
    acc = acc + jnp.maximum(y4, 0.0)

    out_ref[0] = acc


# ---------------------------------------------------------------------------
# Parameter folding (conv bias + inference-mode BatchNorm into weights/shift)
# ---------------------------------------------------------------------------
def _fold(p, eps=1e-5):
    KH, KW, Ci, Co = p["w"].shape
    scale = p["gamma"] / jnp.sqrt(p["var"] + eps)                # (Co,)
    w = (p["w"] * scale).reshape(KH * KW * Ci, Co)               # BN scale folded
    shift = p["beta"] + scale * (p["b"] - p["mean"])             # bias + BN shift
    return w.astype(jnp.float32), shift.astype(jnp.float32)


# ---------------------------------------------------------------------------
# Wrapper: packing, masks, pallas_call, un-padding
# ---------------------------------------------------------------------------
def inconv_forward(x_nchw, p1, p2a, p2b, p3a, p3b, p4):
    N, Cin, H, W = x_nchw.shape
    Cm = p2a["w"].shape[-1]
    Co2 = p1["w"].shape[-1]
    Hp, Wp = H + 4, W + 4
    FLAT = Hp * Wp

    # ---- fold + pack parameters (8 small streams instead of 18) -------------
    w1, t1 = _fold(p1)
    w2a, t2a = _fold(p2a)
    w2b, t2b = _fold(p2b)
    w3a, t3a = _fold(p3a)
    w3b, t3b = _fold(p3b)
    w4, t4 = _fold(p4)

    whead = jnp.concatenate([w1.T, w2a.T, w3a.T], axis=0)          # (Co2+2Cm, Cin)
    thead = jnp.concatenate([t1, t2a, t3a]).reshape(-1, 1)         # (Co2+2Cm, 1)
    w2b_g = w2b.T.reshape(Co2, 3, 3 * Cm).transpose(1, 0, 2)       # (3, Co2, 3*Cm)
    w3b_g = w3b.T.reshape(Co2, 5, 5 * Cm).transpose(1, 0, 2)       # (5, Co2, 5*Cm)
    w4_p = w4.T                                                    # (Co2, Cin)
    ttail = jnp.stack([t2b, t3b, t4], axis=0).reshape(3, Co2, 1)   # (3, Co2, 1)

    # ---- input: zero-pad spatial by 2 and flatten (lane-dense) ---------------
    xbig = jnp.pad(x_nchw, ((0, 0), (0, 0), (2, 2), (2, 2))).reshape(N, Cin, FLAT)

    # ---- masks over the padded flat domain (precomputed, no in-kernel divmod)
    rows = jnp.arange(Hp)
    cols = jnp.arange(Wp)

    def _band(lo_r, hi_r, lo_c, hi_c):
        r = (rows >= lo_r) & (rows < hi_r)
        c = (cols >= lo_c) & (cols < hi_c)
        return (r[:, None] & c[None, :]).astype(jnp.float32).reshape(1, FLAT)

    m_int = _band(2, Hp - 2, 2, Wp - 2)   # original HxW image
    m_r1 = _band(1, Hp - 1, 1, Wp - 1)    # everything except the outermost ring
    masks = jnp.concatenate([m_int, m_r1], axis=0)                 # (2, FLAT)

    kernel = functools.partial(_inconv_kernel, Cin=Cin, Cm=Cm, Co2=Co2,
                               Hp=Hp, Wp=Wp)

    const2 = lambda n: (0, 0)
    const3 = lambda n: (0, 0, 0)

    # TODO(synk): for N == 1 on v7x (2 TensorCores) add a second parallel grid
    # axis over spatial row-tiles so both cores get work.
    out_flat = pl.pallas_call(
        kernel,
        out_shape=jax.ShapeDtypeStruct((N, Co2, FLAT), jnp.float32),
        grid_spec=pltpu.PrefetchScalarGridSpec(
            num_scalar_prefetch=0,
            grid=(N,),
            in_specs=[
                pl.BlockSpec((1, Cin, FLAT), lambda n: (n, 0, 0)),
                pl.BlockSpec(whead.shape, const2),
                pl.BlockSpec(thead.shape, const2),
                pl.BlockSpec(w2b_g.shape, const3),
                pl.BlockSpec(w3b_g.shape, const3),
                pl.BlockSpec(w4_p.shape, const2),
                pl.BlockSpec(ttail.shape, const3),
                pl.BlockSpec(masks.shape, const2),
            ],
            out_specs=pl.BlockSpec((1, Co2, FLAT), lambda n: (n, 0, 0)),
            scratch_shapes=[
                pltpu.VMEM((Cm, FLAT + 2 * MARG), jnp.float32),   # 3x3 halo buf
                pltpu.VMEM((Cm, FLAT + 2 * MARG), jnp.float32),   # 5x5 halo buf
                pltpu.VMEM((Cin, FLAT + 2 * MARG), jnp.float32),  # maxpool halo buf
            ],
        ),
        compiler_params=pltpu.CompilerParams(
            dimension_semantics=("parallel",)),
    )(xbig, whead, thead, w2b_g, w3b_g, w4_p, ttail, masks)

    out = out_flat.reshape(N, Co2, Hp, Wp)[:, :, 2:2 + H, 2:2 + W]
    return out


# ---------------------------------------------------------------------------
# Deterministic parameter init (synthetic weights, no checkpoint load)
# ---------------------------------------------------------------------------
def init_conv_bn(key, KH, KW, Cin, Cout):
    k1, k2, k3, k4, k5, k6 = jax.random.split(key, 6)
    return dict(
        w=0.1 * jax.random.normal(k1, (KH, KW, Cin, Cout), jnp.float32),
        b=0.05 * jax.random.normal(k2, (Cout,), jnp.float32),
        gamma=1.0 + 0.1 * jax.random.normal(k3, (Cout,), jnp.float32),
        beta=0.05 * jax.random.normal(k4, (Cout,), jnp.float32),
        mean=0.1 * jax.random.normal(k5, (Cout,), jnp.float32),
        var=1.0 + 0.2 * jax.random.uniform(k6, (Cout,), jnp.float32),
    )


# ---------------------------------------------------------------------------
# Pure-JAX reference (inference-mode BN), NCHW, for self-check
# ---------------------------------------------------------------------------
def _ref_layer(x, p, padding, eps=1e-5):
    y = lax.conv_general_dilated(
        x, p["w"], (1, 1), [(padding, padding), (padding, padding)],
        dimension_numbers=("NCHW", "HWIO", "NCHW"))
    y = y + p["b"].reshape(1, -1, 1, 1)
    scale = (p["gamma"] / jnp.sqrt(p["var"] + eps)).reshape(1, -1, 1, 1)
    shift = p["beta"].reshape(1, -1, 1, 1) - p["mean"].reshape(1, -1, 1, 1) * scale
    return jnp.maximum(y * scale + shift, 0.0)


def _ref_forward(x, p1, p2a, p2b, p3a, p3b, p4):
    x1 = _ref_layer(x, p1, 0)
    x2 = _ref_layer(_ref_layer(x, p2a, 0), p2b, 1)
    x3 = _ref_layer(_ref_layer(x, p3a, 1), p3b, 1)
    pooled = lax.reduce_window(x, -jnp.inf, lax.max, (1, 1, 3, 3), (1, 1, 1, 1),
                               [(0, 0), (0, 0), (1, 1), (1, 1)])
    x4 = _ref_layer(pooled, p4, 0)
    return x1 + x2 + x3 + x4


# ---------------------------------------------------------------------------
if __name__ == "__main__":
    key = jax.random.PRNGKey(0)
    N, Cin, H, W, outC = 2, 4, 16, 16, 8
    Cm, Co2 = outC, outC * 2

    kx, k1, k2a, k2b, k3a, k3b, k4 = jax.random.split(key, 7)
    x = jax.random.normal(kx, (N, Cin, H, W), jnp.float32)   # PyTorch-style NCHW

    p1 = init_conv_bn(k1, 1, 1, Cin, Co2)    # VGGConv1: 1x1 -> BN -> ReLU
    p2a = init_conv_bn(k2a, 1, 1, Cin, Cm)   # VGGConv2: 1x1 ...
    p2b = init_conv_bn(k2b, 3, 3, Cm, Co2)   #           ... 3x3 pad=1
    p3a = init_conv_bn(k3a, 1, 1, Cin, Cm)   # VGGConv3: 1x1 pad=1 ...
    p3b = init_conv_bn(k3b, 5, 5, Cm, Co2)   #           ... 5x5 pad=1
    p4 = init_conv_bn(k4, 1, 1, Cin, Co2)    # VGGConv4: maxpool -> 1x1

    out = inconv_forward(x, p1, p2a, p2b, p3a, p3b, p4)
    out = jax.block_until_ready(out)

    ref = _ref_forward(x, p1, p2a, p2b, p3a, p3b, p4)
    err = float(jnp.max(jnp.abs(out - ref)))
    assert out.shape == (N, Co2, H, W), out.shape
    assert err < 1e-3, f"max abs err vs reference: {err}"
    print("KERNEL_OK")
</pallas_src>

<mosaic_0001>
module attributes {stable_mosaic.version = 11 : i64} {
  func.func @_inconv_kernel(%arg0: i32, %arg1: memref<1x4x400xf32, #tpu.memory_space<vmem>>, %arg2: memref<32x4xf32, #tpu.memory_space<vmem>>, %arg3: memref<32x1xf32, #tpu.memory_space<vmem>>, %arg4: memref<3x16x24xf32, #tpu.memory_space<vmem>>, %arg5: memref<5x16x40xf32, #tpu.memory_space<vmem>>, %arg6: memref<16x4xf32, #tpu.memory_space<vmem>>, %arg7: memref<3x16x1xf32, #tpu.memory_space<vmem>>, %arg8: memref<2x400xf32, #tpu.memory_space<vmem>>, %arg9: memref<1x16x400xf32, #tpu.memory_space<vmem>>, %arg10: memref<8x656xf32, #tpu.memory_space<vmem>>, %arg11: memref<8x656xf32, #tpu.memory_space<vmem>>, %arg12: memref<4x656xf32, #tpu.memory_space<vmem>>) attributes {dimension_semantics = [#tpu.dimension_semantics<parallel>], iteration_bounds = array<i64: 2>, scalar_prefetch = 0 : i64, scratch_operands = 3 : i64, tpu.core_type = #tpu.core_type<tc>, window_params = [{transform_indices = @transform_0, window_bounds = array<i64: 1, 4, 400>}, {pipeline_mode = #tpu.pipeline_mode<synchronous>, transform_indices = @transform_1, window_bounds = array<i64: 32, 4>}, {pipeline_mode = #tpu.pipeline_mode<synchronous>, transform_indices = @transform_2, window_bounds = array<i64: 32, 1>}, {pipeline_mode = #tpu.pipeline_mode<synchronous>, transform_indices = @transform_3, window_bounds = array<i64: 3, 16, 24>}, {pipeline_mode = #tpu.pipeline_mode<synchronous>, transform_indices = @transform_4, window_bounds = array<i64: 5, 16, 40>}, {pipeline_mode = #tpu.pipeline_mode<synchronous>, transform_indices = @transform_5, window_bounds = array<i64: 16, 4>}, {pipeline_mode = #tpu.pipeline_mode<synchronous>, transform_indices = @transform_6, window_bounds = array<i64: 3, 16, 1>}, {pipeline_mode = #tpu.pipeline_mode<synchronous>, transform_indices = @transform_7, window_bounds = array<i64: 2, 400>}, {transform_indices = @transform_8, window_bounds = array<i64: 1, 16, 400>}]} {
    %c0_i32 = arith.constant 0 : i32
    %0 = arith.cmpi eq, %arg0, %c0_i32 : i32
    %1 = arith.extui %0 : i1 to i32
    %c0_i32_0 = arith.constant 0 : i32
    %2 = arith.cmpi ne, %1, %c0_i32_0 : i32
    scf.if %2 {
      %cst_129 = arith.constant 0.000000e+00 : f32
      %156 = vector.broadcast %cst_129 : f32 to vector<8x656xf32>
      %c0_130 = arith.constant 0 : index
      %c0_131 = arith.constant 0 : index
      %157 = vector.load %arg10[%c0_130, %c0_131] : memref<8x656xf32, #tpu.memory_space<vmem>>, vector<8x656xf32>
      tpu.vector_store %arg10[%c0_130, %c0_131], %156 {strides = array<i32>} : memref<8x656xf32, #tpu.memory_space<vmem>>, vector<8x656xf32>,
      %cst_132 = arith.constant 0.000000e+00 : f32
      %158 = vector.broadcast %cst_132 : f32 to vector<8x656xf32>
      %c0_133 = arith.constant 0 : index
      %c0_134 = arith.constant 0 : index
      %159 = vector.load %arg11[%c0_133, %c0_134] : memref<8x656xf32, #tpu.memory_space<vmem>>, vector<8x656xf32>
      tpu.vector_store %arg11[%c0_133, %c0_134], %158 {strides = array<i32>} : memref<8x656xf32, #tpu.memory_space<vmem>>, vector<8x656xf32>,
      %cst_135 = arith.constant 0.000000e+00 : f32
      %160 = vector.broadcast %cst_135 : f32 to vector<4x656xf32>
      %c0_136 = arith.constant 0 : index
      %c0_137 = arith.constant 0 : index
      %161 = vector.load %arg12[%c0_136, %c0_137] : memref<4x656xf32, #tpu.memory_space<vmem>>, vector<4x656xf32>
      tpu.vector_store %arg12[%c0_136, %c0_137], %160 {strides = array<i32>} : memref<4x656xf32, #tpu.memory_space<vmem>>, vector<4x656xf32>,
    } else {
    }
    %c0 = arith.constant 0 : index
    %c0_1 = arith.constant 0 : index
    %c0_2 = arith.constant 0 : index
    %3 = vector.load %arg1[%c0, %c0_1, %c0_2] : memref<1x4x400xf32, #tpu.memory_space<vmem>>, vector<1x4x400xf32>
    %4 = vector.shape_cast %3 : vector<1x4x400xf32> to vector<4x400xf32>
    %c0_3 = arith.constant 0 : index
    %c0_4 = arith.constant 0 : index
    %5 = vector.load %arg8[%c0_3, %c0_4] : memref<2x400xf32, #tpu.memory_space<vmem>>, vector<1x400xf32>
    %c1 = arith.constant 1 : index
    %c0_5 = arith.constant 0 : index
    %6 = vector.load %arg8[%c1, %c0_5] : memref<2x400xf32, #tpu.memory_space<vmem>>, vector<1x400xf32>
    %c0_6 = arith.constant 0 : index
    %c0_7 = arith.constant 0 : index
    %7 = vector.load %arg2[%c0_6, %c0_7] : memref<32x4xf32, #tpu.memory_space<vmem>>, vector<32x4xf32>
    %cst = arith.constant dense<0.000000e+00> : vector<32x400xf32>
    %8 = tpu.matmul %7, %4, %cst {dimension_numbers = #tpu.dot_dimension_numbers<[1], [0], [0], [1], [0, 0, 1, 1], [], []>} : vector<32x4xf32>, vector<4x400xf32>, vector<32x400xf32> -> vector<32x400xf32>
    %c0_8 = arith.constant 0 : index
    %c0_9 = arith.constant 0 : index
    %9 = vector.load %arg3[%c0_8, %c0_9] : memref<32x1xf32, #tpu.memory_space<vmem>>, vector<32x1xf32>
    %10 = vector.broadcast %9 : vector<32x1xf32> to vector<32x400xf32>
    %11 = arith.addf %8, %10 : vector<32x400xf32>
    %12 = vector.extract_strided_slice %11 {offsets = [0, 0], sizes = [16, 400], strides = [1, 1]} : vector<32x400xf32> to vector<16x400xf32>
    %cst_10 = arith.constant 0.000000e+00 : f32
    %13 = vector.broadcast %cst_10 : f32 to vector<16x400xf32>
    %14 = arith.maximumf %12, %13 : vector<16x400xf32>
    %15 = vector.extract_strided_slice %11 {offsets = [16, 0], sizes = [8, 400], strides = [1, 1]} : vector<32x400xf32> to vector<8x400xf32>
    %cst_11 = arith.constant 0.000000e+00 : f32
    %16 = vector.broadcast %cst_11 : f32 to vector<8x400xf32>
    %17 = arith.maximumf %15, %16 : vector<8x400xf32>
    %18 = vector.broadcast %5 : vector<1x400xf32> to vector<8x400xf32>
    %19 = arith.mulf %17, %18 : vector<8x400xf32>
    %c0_12 = arith.constant 0 : index
    %c128 = arith.constant 128 : index
    %20 = vector.load %arg10[%c0_12, %c128] : memref<8x656xf32, #tpu.memory_space<vmem>>, vector<8x400xf32>
    tpu.vector_store %arg10[%c0_12, %c128], %19 {strides = array<i32>} : memref<8x656xf32, #tpu.memory_space<vmem>>, vector<8x400xf32>,
    %c0_13 = arith.constant 0 : index
    %c0_14 = arith.constant 0 : index
    %c0_15 = arith.constant 0 : index
    %21 = vector.load %arg7[%c0_13, %c0_14, %c0_15] : memref<3x16x1xf32, #tpu.memory_space<vmem>>, vector<1x16x1xf32>
    %22 = vector.shape_cast %21 : vector<1x16x1xf32> to vector<16x1xf32>
    %23 = vector.shape_cast %22 : vector<16x1xf32> to vector<16x1xf32>
    %24 = vector.broadcast %23 : vector<16x1xf32> to vector<16x400xf32>
    %c0_16 = arith.constant 0 : index
    %c107 = arith.constant 107 : index
    %25 = vector.load %arg10[%c0_16, %c107] : memref<8x656xf32, #tpu.memory_space<vmem>>, vector<8x400xf32>
    %c0_17 = arith.constant 0 : index
    %c108 = arith.constant 108 : index
    %26 = vector.load %arg10[%c0_17, %c108] : memref<8x656xf32, #tpu.memory_space<vmem>>, vector<8x400xf32>
    %c0_18 = arith.constant 0 : index
    %c109 = arith.constant 109 : index
    %27 = vector.load %arg10[%c0_18, %c109] : memref<8x656xf32, #tpu.memory_space<vmem>>, vector<8x400xf32>
    %28 = tpu.concatenate %25, %26, %27 in 0 : vector<8x400xf32>, vector<8x400xf32>, vector<8x400xf32> -> vector<24x400xf32>
    %c0_19 = arith.constant 0 : index
    %c0_20 = arith.constant 0 : index
    %c0_21 = arith.constant 0 : index
    %29 = vector.load %arg4[%c0_19, %c0_20, %c0_21] : memref<3x16x24xf32, #tpu.memory_space<vmem>>, vector<1x16x24xf32>
    %30 = vector.shape_cast %29 : vector<1x16x24xf32> to vector<16x24xf32>
    %cst_22 = arith.constant dense<0.000000e+00> : vector<16x400xf32>
    %31 = tpu.matmul %30, %28, %cst_22 {dimension_numbers = #tpu.dot_dimension_numbers<[1], [0], [0], [1], [0, 0, 1, 1], [], []>} : vector<16x24xf32>, vector<24x400xf32>, vector<16x400xf32> -> vector<16x400xf32>
    %32 = arith.addf %24, %31 : vector<16x400xf32>
    %c0_23 = arith.constant 0 : index
    %c127 = arith.constant 127 : index
    %33 = vector.load %arg10[%c0_23, %c127] : memref<8x656xf32, #tpu.memory_space<vmem>>, vector<8x400xf32>
    %c0_24 = arith.constant 0 : index
    %c128_25 = arith.constant 128 : index
    %34 = vector.load %arg10[%c0_24, %c128_25] : memref<8x656xf32, #tpu.memory_space<vmem>>, vector<8x400xf32>
    %c0_26 = arith.constant 0 : index
    %c129 = arith.constant 129 : index
    %35 = vector.load %arg10[%c0_26, %c129] : memref<8x656xf32, #tpu.memory_space<vmem>>, vector<8x400xf32>
    %36 = tpu.concatenate %33, %34, %35 in 0 : vector<8x400xf32>, vector<8x400xf32>, vector<8x400xf32> -> vector<24x400xf32>
    %c1_27 = arith.constant 1 : index
    %c0_28 = arith.constant 0 : index
    %c0_29 = arith.constant 0 : index
    %37 = vector.load %arg4[%c1_27, %c0_28, %c0_29] : memref<3x16x24xf32, #tpu.memory_space<vmem>>, vector<1x16x24xf32>
    %38 = vector.shape_cast %37 : vector<1x16x24xf32> to vector<16x24xf32>
    %cst_30 = arith.constant dense<0.000000e+00> : vector<16x400xf32>
    %39 = tpu.matmul %38, %36, %cst_30 {dimension_numbers = #tpu.dot_dimension_numbers<[1], [0], [0], [1], [0, 0, 1, 1], [], []>} : vector<16x24xf32>, vector<24x400xf32>, vector<16x400xf32> -> vector<16x400xf32>
    %40 = arith.addf %32, %39 : vector<16x400xf32>
    %c0_31 = arith.constant 0 : index
    %c147 = arith.constant 147 : index
    %41 = vector.load %arg10[%c0_31, %c147] : memref<8x656xf32, #tpu.memory_space<vmem>>, vector<8x400xf32>
    %c0_32 = arith.constant 0 : index
    %c148 = arith.constant 148 : index
    %42 = vector.load %arg10[%c0_32, %c148] : memref<8x656xf32, #tpu.memory_space<vmem>>, vector<8x400xf32>
    %c0_33 = arith.constant 0 : index
    %c149 = arith.constant 149 : index
    %43 = vector.load %arg10[%c0_33, %c149] : memref<8x656xf32, #tpu.memory_space<vmem>>, vector<8x400xf32>
    %44 = tpu.concatenate %41, %42, %43 in 0 : vector<8x400xf32>, vector<8x400xf32>, vector<8x400xf32> -> vector<24x400xf32>
    %c2 = arith.constant 2 : index
    %c0_34 = arith.constant 0 : index
    %c0_35 = arith.constant 0 : index
    %45 = vector.load %arg4[%c2, %c0_34, %c0_35] : memref<3x16x24xf32, #tpu.memory_space<vmem>>, vector<1x16x24xf32>
    %46 = vector.shape_cast %45 : vector<1x16x24xf32> to vector<16x24xf32>
    %cst_36 = arith.constant dense<0.000000e+00> : vector<16x400xf32>
    %47 = tpu.matmul %46, %44, %cst_36 {dimension_numbers = #tpu.dot_dimension_numbers<[1], [0], [0], [1], [0, 0, 1, 1], [], []>} : vector<16x24xf32>, vector<24x400xf32>, vector<16x400xf32> -> vector<16x400xf32>
    %48 = arith.addf %40, %47 : vector<16x400xf32>
    %cst_37 = arith.constant 0.000000e+00 : f32
    %49 = vector.broadcast %cst_37 : f32 to vector<16x400xf32>
    %50 = arith.maximumf %48, %49 : vector<16x400xf32>
    %51 = arith.addf %14, %50 : vector<16x400xf32>
    %52 = vector.extract_strided_slice %11 {offsets = [24, 0], sizes = [8, 400], strides = [1, 1]} : vector<32x400xf32> to vector<8x400xf32>
    %cst_38 = arith.constant 0.000000e+00 : f32
    %53 = vector.broadcast %cst_38 : f32 to vector<8x400xf32>
    %54 = arith.maximumf %52, %53 : vector<8x400xf32>
    %55 = vector.broadcast %6 : vector<1x400xf32> to vector<8x400xf32>
    %56 = arith.mulf %54, %55 : vector<8x400xf32>
    %c0_39 = arith.constant 0 : index
    %c128_40 = arith.constant 128 : index
    %57 = vector.load %arg11[%c0_39, %c128_40] : memref<8x656xf32, #tpu.memory_space<vmem>>, vector<8x400xf32>
    tpu.vector_store %arg11[%c0_39, %c128_40], %56 {strides = array<i32>} : memref<8x656xf32, #tpu.memory_space<vmem>>, vector<8x400xf32>,
    %c1_41 = arith.constant 1 : index
    %c0_42 = arith.constant 0 : index
    %c0_43 = arith.constant 0 : index
    %58 = vector.load %arg7[%c1_41, %c0_42, %c0_43] : memref<3x16x1xf32, #tpu.memory_space<vmem>>, vector<1x16x1xf32>
    %59 = vector.shape_cast %58 : vector<1x16x1xf32> to vector<16x1xf32>
    %60 = vector.shape_cast %59 : vector<16x1xf32> to vector<16x1xf32>
    %61 = vector.broadcast %60 : vector<16x1xf32> to vector<16x400xf32>
    %c0_44 = arith.constant 0 : index
    %c86 = arith.constant 86 : index
    %62 = vector.load %arg11[%c0_44, %c86] : memref<8x656xf32, #tpu.memory_space<vmem>>, vector<8x400xf32>
    %c0_45 = arith.constant 0 : index
    %c87 = arith.constant 87 : index
    %63 = vector.load %arg11[%c0_45, %c87] : memref<8x656xf32, #tpu.memory_space<vmem>>, vector<8x400xf32>
    %c0_46 = arith.constant 0 : index
    %c88 = arith.constant 88 : index
    %64 = vector.load %arg11[%c0_46, %c88] : memref<8x656xf32, #tpu.memory_space<vmem>>, vector<8x400xf32>
    %c0_47 = arith.constant 0 : index
    %c89 = arith.constant 89 : index
    %65 = vector.load %arg11[%c0_47, %c89] : memref<8x656xf32, #tpu.memory_space<vmem>>, vector<8x400xf32>
    %c0_48 = arith.constant 0 : index
    %c90 = arith.constant 90 : index
    %66 = vector.load %arg11[%c0_48, %c90] : memref<8x656xf32, #tpu.memory_space<vmem>>, vector<8x400xf32>
    %67 = tpu.concatenate %62, %63, %64, %65, %66 in 0 : vector<8x400xf32>, vector<8x400xf32>, vector<8x400xf32>, vector<8x400xf32>, vector<8x400xf32> -> vector<40x400xf32>
    %c0_49 = arith.constant 0 : index
    %c0_50 = arith.constant 0 : index
    %c0_51 = arith.constant 0 : index
    %68 = vector.load %arg5[%c0_49, %c0_50, %c0_51] : memref<5x16x40xf32, #tpu.memory_space<vmem>>, vector<1x16x40xf32>
    %69 = vector.shape_cast %68 : vector<1x16x40xf32> to vector<16x40xf32>
    %cst_52 = arith.constant dense<0.000000e+00> : vector<16x400xf32>
    %70 = tpu.matmul %69, %67, %cst_52 {dimension_numbers = #tpu.dot_dimension_numbers<[1], [0], [0], [1], [0, 0, 1, 1], [], []>} : vector<16x40xf32>, vector<40x400xf32>, vector<16x400xf32> -> vector<16x400xf32>
    %71 = arith.addf %61, %70 : vector<16x400xf32>
    %c0_53 = arith.constant 0 : index
    %c106 = arith.constant 106 : index
    %72 = vector.load %arg11[%c0_53, %c106] : memref<8x656xf32, #tpu.memory_space<vmem>>, vector<8x400xf32>
    %c0_54 = arith.constant 0 : index
    %c107_55 = arith.constant 107 : index
    %73 = vector.load %arg11[%c0_54, %c107_55] : memref<8x656xf32, #tpu.memory_space<vmem>>, vector<8x400xf32>
    %c0_56 = arith.constant 0 : index
    %c108_57 = arith.constant 108 : index
    %74 = vector.load %arg11[%c0_56, %c108_57] : memref<8x656xf32, #tpu.memory_space<vmem>>, vector<8x400xf32>
    %c0_58 = arith.constant 0 : index
    %c109_59 = arith.constant 109 : index
    %75 = vector.load %arg11[%c0_58, %c109_59] : memref<8x656xf32, #tpu.memory_space<vmem>>, vector<8x400xf32>
    %c0_60 = arith.constant 0 : index
    %c110 = arith.constant 110 : index
    %76 = vector.load %arg11[%c0_60, %c110] : memref<8x656xf32, #tpu.memory_space<vmem>>, vector<8x400xf32>
    %77 = tpu.concatenate %72, %73, %74, %75, %76 in 0 : vector<8x400xf32>, vector<8x400xf32>, vector<8x400xf32>, vector<8x400xf32>, vector<8x400xf32> -> vector<40x400xf32>
    %c1_61 = arith.constant 1 : index
    %c0_62 = arith.constant 0 : index
    %c0_63 = arith.constant 0 : index
    %78 = vector.load %arg5[%c1_61, %c0_62, %c0_63] : memref<5x16x40xf32, #tpu.memory_space<vmem>>, vector<1x16x40xf32>
    %79 = vector.shape_cast %78 : vector<1x16x40xf32> to vector<16x40xf32>
    %cst_64 = arith.constant dense<0.000000e+00> : vector<16x400xf32>
    %80 = tpu.matmul %79, %77, %cst_64 {dimension_numbers = #tpu.dot_dimension_numbers<[1], [0], [0], [1], [0, 0, 1, 1], [], []>} : vector<16x40xf32>, vector<40x400xf32>, vector<16x400xf32> -> vector<16x400xf32>
    %81 = arith.addf %71, %80 : vector<16x400xf32>
    %c0_65 = arith.constant 0 : index
    %c126 = arith.constant 126 : index
    %82 = vector.load %arg11[%c0_65, %c126] : memref<8x656xf32, #tpu.memory_space<vmem>>, vector<8x400xf32>
    %c0_66 = arith.constant 0 : index
    %c127_67 = arith.constant 127 : index
    %83 = vector.load %arg11[%c0_66, %c127_67] : memref<8x656xf32, #tpu.memory_space<vmem>>, vector<8x400xf32>
    %c0_68 = arith.constant 0 : index
    %c128_69 = arith.constant 128 : index
    %84 = vector.load %arg11[%c0_68, %c128_69] : memref<8x656xf32, #tpu.memory_space<vmem>>, vector<8x400xf32>
    %c0_70 = arith.constant 0 : index
    %c129_71 = arith.constant 129 : index
    %85 = vector.load %arg11[%c0_70, %c129_71] : memref<8x656xf32, #tpu.memory_space<vmem>>, vector<8x400xf32>
    %c0_72 = arith.constant 0 : index
    %c130 = arith.constant 130 : index
    %86 = vector.load %arg11[%c0_72, %c130] : memref<8x656xf32, #tpu.memory_space<vmem>>, vector<8x400xf32>
    %87 = tpu.concatenate %82, %83, %84, %85, %86 in 0 : vector<8x400xf32>, vector<8x400xf32>, vector<8x400xf32>, vector<8x400xf32>, vector<8x400xf32> -> vector<40x400xf32>
    %c2_73 = arith.constant 2 : index
    %c0_74 = arith.constant 0 : index
    %c0_75 = arith.constant 0 : index
    %88 = vector.load %arg5[%c2_73, %c0_74, %c0_75] : memref<5x16x40xf32, #tpu.memory_space<vmem>>, vector<1x16x40xf32>
    %89 = vector.shape_cast %88 : vector<1x16x40xf32> to vector<16x40xf32>
    %cst_76 = arith.constant dense<0.000000e+00> : vector<16x400xf32>
    %90 = tpu.matmul %89, %87, %cst_76 {dimension_numbers = #tpu.dot_dimension_numbers<[1], [0], [0], [1], [0, 0, 1, 1], [], []>} : vector<16x40xf32>, vector<40x400xf32>, vector<16x400xf32> -> vector<16x400xf32>
    %91 = arith.addf %81, %90 : vector<16x400xf32>
    %c0_77 = arith.constant 0 : index
    %c146 = arith.constant 146 : index
    %92 = vector.load %arg11[%c0_77, %c146] : memref<8x656xf32, #tpu.memory_space<vmem>>, vector<8x400xf32>
    %c0_78 = arith.constant 0 : index
    %c147_79 = arith.constant 147 : index
    %93 = vector.load %arg11[%c0_78, %c147_79] : memref<8x656xf32, #tpu.memory_space<vmem>>, vector<8x400xf32>
    %c0_80 = arith.constant 0 : index
    %c148_81 = arith.constant 148 : index
    %94 = vector.load %arg11[%c0_80, %c148_81] : memref<8x656xf32, #tpu.memory_space<vmem>>, vector<8x400xf32>
    %c0_82 = arith.constant 0 : index
    %c149_83 = arith.constant 149 : index
    %95 = vector.load %arg11[%c0_82, %c149_83] : memref<8x656xf32, #tpu.memory_space<vmem>>, vector<8x400xf32>
    %c0_84 = arith.constant 0 : index
    %c150 = arith.constant 150 : index
    %96 = vector.load %arg11[%c0_84, %c150] : memref<8x656xf32, #tpu.memory_space<vmem>>, vector<8x400xf32>
    %97 = tpu.concatenate %92, %93, %94, %95, %96 in 0 : vector<8x400xf32>, vector<8x400xf32>, vector<8x400xf32>, vector<8x400xf32>, vector<8x400xf32> -> vector<40x400xf32>
    %c3 = arith.constant 3 : index
    %c0_85 = arith.constant 0 : index
    %c0_86 = arith.constant 0 : index
    %98 = vector.load %arg5[%c3, %c0_85, %c0_86] : memref<5x16x40xf32, #tpu.memory_space<vmem>>, vector<1x16x40xf32>
    %99 = vector.shape_cast %98 : vector<1x16x40xf32> to vector<16x40xf32>
    %cst_87 = arith.constant dense<0.000000e+00> : vector<16x400xf32>
    %100 = tpu.matmul %99, %97, %cst_87 {dimension_numbers = #tpu.dot_dimension_numbers<[1], [0], [0], [1], [0, 0, 1, 1], [], []>} : vector<16x40xf32>, vector<40x400xf32>, vector<16x400xf32> -> vector<16x400xf32>
    %101 = arith.addf %91, %100 : vector<16x400xf32>
    %c0_88 = arith.constant 0 : index
    %c166 = arith.constant 166 : index
    %102 = vector.load %arg11[%c0_88, %c166] : memref<8x656xf32, #tpu.memory_space<vmem>>, vector<8x400xf32>
    %c0_89 = arith.constant 0 : index
    %c167 = arith.constant 167 : index
    %103 = vector.load %arg11[%c0_89, %c167] : memref<8x656xf32, #tpu.memory_space<vmem>>, vector<8x400xf32>
    %c0_90 = arith.constant 0 : index
    %c168 = arith.constant 168 : index
    %104 = vector.load %arg11[%c0_90, %c168] : memref<8x656xf32, #tpu.memory_space<vmem>>, vector<8x400xf32>
    %c0_91 = arith.constant 0 : index
    %c169 = arith.constant 169 : index
    %105 = vector.load %arg11[%c0_91, %c169] : memref<8x656xf32, #tpu.memory_space<vmem>>, vector<8x400xf32>
    %c0_92 = arith.constant 0 : index
    %c170 = arith.constant 170 : index
    %106 = vector.load %arg11[%c0_92, %c170] : memref<8x656xf32, #tpu.memory_space<vmem>>, vector<8x400xf32>
    %107 = tpu.concatenate %102, %103, %104, %105, %106 in 0 : vector<8x400xf32>, vector<8x400xf32>, vector<8x400xf32>, vector<8x400xf32>, vector<8x400xf32> -> vector<40x400xf32>
    %c4 = arith.constant 4 : index
    %c0_93 = arith.constant 0 : index
    %c0_94 = arith.constant 0 : index
    %108 = vector.load %arg5[%c4, %c0_93, %c0_94] : memref<5x16x40xf32, #tpu.memory_space<vmem>>, vector<1x16x40xf32>
    %109 = vector.shape_cast %108 : vector<1x16x40xf32> to vector<16x40xf32>
    %cst_95 = arith.constant dense<0.000000e+00> : vector<16x400xf32>
    %110 = tpu.matmul %109, %107, %cst_95 {dimension_numbers = #tpu.dot_dimension_numbers<[1], [0], [0], [1], [0, 0, 1, 1], [], []>} : vector<16x40xf32>, vector<40x400xf32>, vector<16x400xf32> -> vector<16x400xf32>
    %111 = arith.addf %101, %110 : vector<16x400xf32>
    %cst_96 = arith.constant 0.000000e+00 : f32
    %112 = vector.broadcast %cst_96 : f32 to vector<16x400xf32>
    %113 = arith.maximumf %111, %112 : vector<16x400xf32>
    %114 = arith.addf %51, %113 : vector<16x400xf32>
    %cst_97 = arith.constant 0.000000e+00 : f32
    %115 = vector.broadcast %cst_97 : f32 to vector<1x400xf32>
    %116 = arith.cmpf one, %5, %115 : vector<1x400xf32>
    %cst_98 = arith.constant 0xFF800000 : f32
    %117 = vector.shape_cast %116 : vector<1x400xi1> to vector<1x400xi1>
    %118 = vector.broadcast %117 : vector<1x400xi1> to vector<4x400xi1>
    %119 = vector.broadcast %cst_98 : f32 to vector<4x400xf32>
    %120 = arith.select %118, %4, %119 : vector<4x400xi1>, vector<4x400xf32>
    %c0_99 = arith.constant 0 : index
    %c128_100 = arith.constant 128 : index
    %121 = vector.load %arg12[%c0_99, %c128_100] : memref<4x656xf32, #tpu.memory_space<vmem>>, vector<4x400xf32>
    tpu.vector_store %arg12[%c0_99, %c128_100], %120 {strides = array<i32>} : memref<4x656xf32, #tpu.memory_space<vmem>>, vector<4x400xf32>,
    %c0_101 = arith.constant 0 : index
    %c107_102 = arith.constant 107 : index
    %122 = vector.load %arg12[%c0_101, %c107_102] : memref<4x656xf32, #tpu.memory_space<vmem>>, vector<4x400xf32>
    %123 = arith.maximumf %120, %122 : vector<4x400xf32>
    %c0_103 = arith.constant 0 : index
    %c108_104 = arith.constant 108 : index
    %124 = vector.load %arg12[%c0_103, %c108_104] : memref<4x656xf32, #tpu.memory_space<vmem>>, vector<4x400xf32>
    %125 = arith.maximumf %123, %124 : vector<4x400xf32>
    %c0_105 = arith.constant 0 : index
    %c109_106 = arith.constant 109 : index
    %126 = vector.load %arg12[%c0_105, %c109_106] : memref<4x656xf32, #tpu.memory_space<vmem>>, vector<4x400xf32>
    %127 = arith.maximumf %125, %126 : vector<4x400xf32>
    %c0_107 = arith.constant 0 : index
    %c127_108 = arith.constant 127 : index
    %128 = vector.load %arg12[%c0_107, %c127_108] : memref<4x656xf32, #tpu.memory_space<vmem>>, vector<4x400xf32>
    %129 = arith.maximumf %127, %128 : vector<4x400xf32>
    %c0_109 = arith.constant 0 : index
    %c129_110 = arith.constant 129 : index
    %130 = vector.load %arg12[%c0_109, %c129_110] : memref<4x656xf32, #tpu.memory_space<vmem>>, vector<4x400xf32>
    %131 = arith.maximumf %129, %130 : vector<4x400xf32>
    %c0_111 = arith.constant 0 : index
    %c147_112 = arith.constant 147 : index
    %132 = vector.load %arg12[%c0_111, %c147_112] : memref<4x656xf32, #tpu.memory_space<vmem>>, vector<4x400xf32>
    %133 = arith.maximumf %131, %132 : vector<4x400xf32>
    %c0_113 = arith.constant 0 : index
    %c148_114 = arith.constant 148 : index
    %134 = vector.load %arg12[%c0_113, %c148_114] : memref<4x656xf32, #tpu.memory_space<vmem>>, vector<4x400xf32>
    %135 = arith.maximumf %133, %134 : vector<4x400xf32>
    %c0_115 = arith.constant 0 : index
    %c149_116 = arith.constant 149 : index
    %136 = vector.load %arg12[%c0_115, %c149_116] : memref<4x656xf32, #tpu.memory_space<vmem>>, vector<4x400xf32>
    %137 = arith.maximumf %135, %136 : vector<4x400xf32>
    %cst_117 = arith.constant 0.000000e+00 : f32
    %138 = vector.broadcast %cst_117 : f32 to vector<1x400xf32>
    %139 = arith.cmpf one, %5, %138 : vector<1x400xf32>
    %cst_118 = arith.constant 0.000000e+00 : f32
    %140 = vector.shape_cast %139 : vector<1x400xi1> to vector<1x400xi1>
    %141 = vector.broadcast %140 : vector<1x400xi1> to vector<4x400xi1>
    %142 = vector.broadcast %cst_118 : f32 to vector<4x400xf32>
    %143 = arith.select %141, %137, %142 : vector<4x400xi1>, vector<4x400xf32>
    %c0_119 = arith.constant 0 : index
    %c0_120 = arith.constant 0 : index
    %144 = vector.load %arg6[%c0_119, %c0_120] : memref<16x4xf32, #tpu.memory_space<vmem>>, vector<16x4xf32>
    %cst_121 = arith.constant dense<0.000000e+00> : vector<16x400xf32>
    %145 = tpu.matmul %144, %143, %cst_121 {dimension_numbers = #tpu.dot_dimension_numbers<[1], [0], [0], [1], [0, 0, 1, 1], [], []>} : vector<16x4xf32>, vector<4x400xf32>, vector<16x400xf32> -> vector<16x400xf32>
    %c2_122 = arith.constant 2 : index
    %c0_123 = arith.constant 0 : index
    %c0_124 = arith.constant 0 : index
    %146 = vector.load %arg7[%c2_122, %c0_123, %c0_124] : memref<3x16x1xf32, #tpu.memory_space<vmem>>, vector<1x16x1xf32>
    %147 = vector.shape_cast %146 : vector<1x16x1xf32> to vector<16x1xf32>
    %148 = vector.broadcast %147 : vector<16x1xf32> to vector<16x400xf32>
    %149 = arith.addf %145, %148 : vector<16x400xf32>
    %cst_125 = arith.constant 0.000000e+00 : f32
    %150 = vector.broadcast %cst_125 : f32 to vector<16x400xf32>
    %151 = arith.maximumf %149, %150 : vector<16x400xf32>
    %152 = arith.addf %114, %151 : vector<16x400xf32>
    %c0_126 = arith.constant 0 : index
    %c0_127 = arith.constant 0 : index
    %c0_128 = arith.constant 0 : index
    %153 = vector.load %arg9[%c0_126, %c0_127, %c0_128] : memref<1x16x400xf32, #tpu.memory_space<vmem>>, vector<1x16x400xf32>
    %154 = vector.shape_cast %153 : vector<1x16x400xf32> to vector<16x400xf32>
    %155 = vector.shape_cast %152 : vector<16x400xf32> to vector<1x16x400xf32>
    tpu.vector_store %arg9[%c0_126, %c0_127, %c0_128], %155 {strides = array<i32>} : memref<1x16x400xf32, #tpu.memory_space<vmem>>, vector<1x16x400xf32>,
    return
  }
  func.func @transform_0(%arg0: i32) -> (i32, i32, i32) {
    %c0_i32 = arith.constant 0 : i32
    %c0_i32_0 = arith.constant 0 : i32
    %c0_i32_1 = arith.constant 0 : i32
    return %arg0, %c0_i32, %c0_i32_0 : i32, i32, i32
  }
  func.func @transform_1(%arg0: i32) -> (i32, i32) {
    %c0_i32 = arith.constant 0 : i32
    %c0_i32_0 = arith.constant 0 : i32
    %c0_i32_1 = arith.constant 0 : i32
    return %c0_i32, %c0_i32_0 : i32, i32
  }
  func.func @transform_2(%arg0: i32) -> (i32, i32) {
    %c0_i32 = arith.constant 0 : i32
    %c0_i32_0 = arith.constant 0 : i32
    %c0_i32_1 = arith.constant 0 : i32
    return %c0_i32, %c0_i32_0 : i32, i32
  }
  func.func @transform_3(%arg0: i32) -> (i32, i32, i32) {
    %c0_i32 = arith.constant 0 : i32
    %c0_i32_0 = arith.constant 0 : i32
    %c0_i32_1 = arith.constant 0 : i32
    %c0_i32_2 = arith.constant 0 : i32
    return %c0_i32, %c0_i32_0, %c0_i32_1 : i32, i32, i32
  }
  func.func @transform_4(%arg0: i32) -> (i32, i32, i32) {
    %c0_i32 = arith.constant 0 : i32
    %c0_i32_0 = arith.constant 0 : i32
    %c0_i32_1 = arith.constant 0 : i32
    %c0_i32_2 = arith.constant 0 : i32
    return %c0_i32, %c0_i32_0, %c0_i32_1 : i32, i32, i32
  }
  func.func @transform_5(%arg0: i32) -> (i32, i32) {
    %c0_i32 = arith.constant 0 : i32
    %c0_i32_0 = arith.constant 0 : i32
    %c0_i32_1 = arith.constant 0 : i32
    return %c0_i32, %c0_i32_0 : i32, i32
  }
  func.func @transform_6(%arg0: i32) -> (i32, i32, i32) {
    %c0_i32 = arith.constant 0 : i32
    %c0_i32_0 = arith.constant 0 : i32
    %c0_i32_1 = arith.constant 0 : i32
    %c0_i32_2 = arith.constant 0 : i32
    return %c0_i32, %c0_i32_0, %c0_i32_1 : i32, i32, i32
  }
  func.func @transform_7(%arg0: i32) -> (i32, i32) {
    %c0_i32 = arith.constant 0 : i32
    %c0_i32_0 = arith.constant 0 : i32
    %c0_i32_1 = arith.constant 0 : i32
    return %c0_i32, %c0_i32_0 : i32, i32
  }
  func.func @transform_8(%arg0: i32) -> (i32, i32, i32) {
    %c0_i32 = arith.constant 0 : i32
    %c0_i32_0 = arith.constant 0 : i32
    %c0_i32_1 = arith.constant 0 : i32
    return %arg0, %c0_i32, %c0_i32_0 : i32, i32, i32
  }
}

</mosaic_0001>

<bundles_post_ra>
// kernel: tpu_custom_call.1
= control target key start
LH: loop header
LB: loop body
LE: loop exit
PB: predicated region body
PF: predicated region fallthrough
CT: control target
= control target key end

     0   :  { %13 = vsyncpa [#allocation6], 0  ;;  %s5529_s0 = inlined_call_operand.hbm [shape: f32[2,4,400], index: 0, kind: input, shape index: {}]   ;;  %s5530_s1 = inlined_call_operand.vmem [shape: f32[32,4], index: 1, kind: input, shape index: {}]   ;;  %s5531_s2 = inlined_call_operand.vmem [shape: f32[32,1], index: 2, kind: input, shape index: {}]   ;;  %s5532_s3 = inlined_call_operand.vmem [shape: f32[3,16,24], index: 3, kind: input, shape index: {}]   ;;  %s5533_s4 = inlined_call_operand.vmem [shape: f32[5,16,40], index: 4, kind: input, shape index: {}]   ;;  %s5534_s5 = inlined_call_operand.vmem [shape: f32[16,4], index: 5, kind: input, shape index: {}]   ;;  %s5535_s6 = inlined_call_operand.vmem [shape: f32[3,16,1], index: 6, kind: input, shape index: {}]   ;;  %s5536_s7 = inlined_call_operand.vmem [shape: f32[2,400], index: 7, kind: input, shape index: {}]   ;;  %s5537_s8 = inlined_call_operand.hbm [shape: f32[2,16,400], index: 8, kind: output, shape index: {}]  }
   0x1   :  { %15 = vsyncpa [#allocation6 + $0x1], 0 }
   0x2   :  { %16 = vsyncpa [#allocation7], 0 }
   0x3   :  { %18 = vsyncpa [#allocation7 + $0x1], 0  ;;  %s4166_s27 = smov 0   ;;  %s4168_s28 = smov 0  }
   0x4   :  { %s4170_s29 = smov 0   ;;  %s4172_s30 = smov 0  }
   0x5 LB: > { %s4187_s9 = sadd.s32 4294967295, %s4096_s30   ;;  %s3314_s10 = sadd.s32 4294967294, %s4096_s30   ;;  %s4096_s30 = sphi %s4172_s30, %s5705_s30   ;;  %s4092_s29 = sphi %s4170_s29, %s5704_s29   ;;  %s4088_s28 = sphi %s4168_s28, %s5703_s28   ;;  %s4084_s27 = sphi %s4166_s27, %s5702_s27  }
   0x6   : > { %s4191_s11 = sadd.s32 1, %s4096_s30   ;;  %s31_s12 = sadd.s32 1, %s4092_s29 }
   0x7   : > { %s28_s13 = ssub.s32 %s4096_s30, %s4191_s11  ;;  %p38_p0 = scmp.ne.s32.totalorder %s4092_s29, %s4088_s28 }
   0x8   : > { %p29_p1 = scmp.eq.s32.totalorder %s28_s13, 0  ;;  %p39_p2 = scmp.eq.s32.totalorder %s4096_s30, 0 }
   0x9   : > { %p44_p3 = scmp.ne.s32.totalorder %s4088_s28, %s4084_s27  ;;  %p45_p4 = scmp.eq.s32.totalorder %s4187_s9, 0 }
   0xa   : > { %s4203_s14 = scalar_select %p29_p1, %s4092_s29, %s31_s12  }
   0xb   : > { %p4205_p5 = por %p39_p2, %p38_p0  ;;  %p4209_p6 = por %p45_p4, %p44_p3 }
   0xc   : > { %p215_p7 = scmp.eq.s32.totalorder %s4187_s9, 1  ;;  %p221_p8 = scmp.eq.s32.totalorder %s3314_s10, 1 }
   0xd   : > { %p3580_p10 = scmp.lt.s32.totalorder %s4096_s30, 2  ;;  %s262_s19 = sand.u32 1, %s4092_s29  }
   0xe   : > { %p4216_p11 = por %p215_p7, %p38_p0  ;;  %p4220_p12 = por %p221_p8, %p44_p3 }
   0xf   : > { %s3398_s20 = sshll.u32 %s4096_s30, 8  ;;  %s3317_s21 = sshll.u32 %s262_s19, 4 }
  0x10   : > { %s5584_s17 = scalar_select %p4216_p11, 1, 0 }
  0x11   : > { %s5585_s18 = scalar_select %p4220_p12, 1, 0 }
  0x12   : > { %s4229_s24 = scalar_lea.hbm %s5529_s0, %s3398_s20  ;;  %s266_s25 = scalar_lea.vmem [#allocation5], %s3317_s21 }
  0x13   : > { %s274_s26 = sshll.u32 %s266_s25, 4  ;;  %p4233_p13 = pnand %p3580_p10, %p4205_p5  ;;  %s4237_s26 = int_to_ptr.vmem [resolvable:$true] %s274_s26 }
  0x14   : > { %s263_s12 = scalar_lea.sflag [#allocation6], %s262_s19  ;;  %s4000_s13 = scalar_lea.hbm %s4229_s24, 256 }
  0x15   : > { %p4001_p2 = scmp.ne.s32.totalorder %s4229_s24, %s4000_s13  ;;  %p4002_p3 = pneg %p4233_p13 }
  0x16   : > { %s4005_s21 = scalar_lea.hbm %s5529_s0, 512  ;;  %p4006_p5 = scmp.lt.u32.totalorder %s4229_s24, %s5529_s0 }
  0x17   : > { %p4003_p4 = pnand %p4002_p3, %p4001_p2  ;;  %p4007_p8 = scmp.lt.u32.totalorder %s4005_s21, %s4000_s13 }
  0x18   : > { %p4009_p9 = scmp.lt.u32.totalorder %s4000_s13, %s4229_s24 }
  0x19   : > { %p4004_p7 = pneg %p4003_p4  ;;  %p4008_p10 = por %p4007_p8, %p4006_p5 }
  0x1b   : > { %p4010_p0 = por %p4009_p9, %p4008_p10 }
  0x1d   : > { %p4011_p1 = pnand %p4010_p0, %p4004_p7 }
  0x1f   : > { %4014 = shalt.err (!%p4011_p1)
}
  0x20   : > { %s4015_s19 = scalar_lea.vmem %s4237_s26, 256  ;;  %s4098_s25 = smov [#allocation5]  }
  0x21   : > { %p4016_p2 = scmp.ne.s32.totalorder %s4237_s26, %s4015_s19  ;;  %s4020_s15 = sshll.u32 %s4098_s25, 4  ;;  %s4021_s15 = int_to_ptr.vmem [resolvable:$false] %s4020_s15 }
  0x22   : > { %s4022_s20 = scalar_lea.vmem %s4021_s15, 512  ;;  %p4023_p11 = scmp.lt.s32.totalorder %s4237_s26, %s4021_s15 }
  0x23   : > { %p4018_p4 = pnand %p4016_p2, %p4002_p3  ;;  %p4024_p5 = scmp.lt.s32.totalorder %s4022_s20, %s4015_s19 }
  0x25   : > { %p4019_p12 = pneg %p4018_p4  ;;  %p4025_p8 = por %p4024_p5, %p4023_p11 }
  0x27   : > { %p4026_p9 = pnand %p4025_p8, %p4019_p12 }
  0x29   : > { %4029 = shalt.err (!%p4026_p9)
}
  0x2a   : > { %3575 = dma.hbm_to_vmem [thread:$0]  (!%p4233_p13), %s4229_s24, 256, %s4237_s26, %s263_s12  }
  0x2b   : > { %p5587_p0 = scmp.lt.s32.totalorder %s4096_s30, 3  ;;  %p5588_p1 = scmp.ge.s32.totalorder %s4096_s30, 1 }
  0x2d   : > { %p280_p3 = pnand %p5588_p1, %p5587_p0 }
  0x2f   : > { %283 = sbr.rel (%p280_p3) target bundleno = 948 (0x3b4), region = 52 }
  0x36   : > { %s4271_s13 = sand.u32 1, %s4088_s28  }
  0x37   : > { %s3321_s21 = sshll.u32 %s4271_s13, 4  ;;  %s286_s22 = scalar_lea.sflag [#allocation6], %s4271_s13 }
  0x38   : > { %s289_s23 = scalar_lea.vmem [#allocation5], %s3321_s21 }
  0x39   : > { %4075 = dma.done.wait (%p4209_p6), %s286_s22, 256  }
  0x3a   : > { %4077 = vsyncadd (%p4209_p6), %s286_s22, 4294967040  ;;  %s3322_s24 = sshll.u32 %s4271_s13, 6  ;;  %p3323_p11 = scmp.ne.s32.totalorder %s4187_s9, 0 }
  0x3b   : > { %s4280_s26 = scalar_lea.vmem [#allocation8], %s3322_s24  ;;  %vm341_vm0 = vcmask (!%p3323_p11), 1043456   ;;  %vm342_vm1 = vcmask (!%p3323_p11), 130052   ;;  %v4099_v0 = vmov (!%p3323_p11), 0.0  }
  0x3c   : > { %325 = sbr.rel (%p3323_p11) target bundleno = 67 (0x43), region = 60  ;;  %326 = vst [vmem:[#allocation2] sm:$0xff] (!%p3323_p11), %v4099_v0  ;;  %330 = vst [vmem:[#allocation2 + $0x20] sm:$0xff] (!%p3323_p11), %v4099_v0 }
  0x3d   : > { %333 = vst [vmem:[#allocation3] sm:$0xff] (!%p3323_p11), %v4099_v0  ;;  %337 = vst [vmem:[#allocation3 + $0x20] sm:$0xff] (!%p3323_p11), %v4099_v0 }
  0x3e   : > { %339 = vst [vmem:[#allocation4] sm:$0xff] (!%p3323_p11), %v4099_v0  ;;  %340 = vst [vmem:[#allocation4 + $0x8] sm:$0xff] (!%p3323_p11), %v4099_v0 }
  0x3f   : > { %vm343_vm2 = vmor (!%p3323_p11), %vm342_vm1, %vm341_vm0 }
  0x40   : > { %344 = vst.msk [vmem:[#allocation4 + $0x10] sm:$0xff] (!%p3323_p11), %vm343_vm2, %v4099_v0 }
  0x43 PF: > { %v345_v1 = vld [vmem:[%s289_s23] sm:$0xff]  ;;  %vm395_vm3 = vcmask 1043456   ;;  %v346_v2 = vld [vmem:[%s289_s23 + $0x8] sm:$0xff]  ;;  %v595_v3 = vlaneseq  ;;  %v5541_v6 = vmov 0.0   ;;  %vm382_vm4 = vcmask 31744   ;;  %s4102_s16 = smov 126  }
  0x44   : > { %v380_v4 = vcombine.high %v345_v1, %v345_v1  ;;  %v381_v5 = vcombine.high %v346_v2, %v346_v2  ;;  %468 = vmatprep.mubr.f32.mxu0 %v5541_v6  ;;  %557 = vmatprep.mubr.f32.mxu1 %v5541_v6  ;;  %v350_v7 = vld [vmem:[%s5530_s1] sm:$0xff]  ;;  %v4101_v9 = vmov 0   ;;  %v356_v15 = vld [vmem:[%s5531_s2 + $0x10] sm:$0xff]  ;;  %v355_v16 = vld [vmem:[%s5531_s2 + $0x8] sm:$0xff]  ;;  %vm2836_vm6 = vcmask 130052   ;;  %s4103_s10 = smov 127  }
  0x45   : > { %v596_v8 = vshrl.u32 %v595_v3, 7  ;;  %3635 = vset.pattern.permute.xlu0 %v4101_v9  ;;  %v4291_v10 = vld [vmem:[%s5536_s7] ss:$2 sm:$0xf]  ;;  %3636 = vset.pattern.permute.xlu1 %v4101_v9  ;;  %v351_v18 = vld [vmem:[%s5530_s1 + $0x8] sm:$0xff]  ;;  %v5589_v23 = vmov 0  ;;  %vm2837_vm11 = vmor %vm2836_vm6, %vm395_vm3 }
  0x46   : > { %3325 = vmatprep.subr.msk.mxu0 %vm395_vm3, %v380_v4  ;;  %3331 = vmatprep.subr.msk.mxu1 %vm395_vm3, %v381_v5  ;;  %vm2799_vm5 = vcmp.ne.f32.partialorder %v4291_v10, 0.0  ;;  %v5592_v24 = vmov 0  ;;  %v5595_v25 = vmov 0  ;;  %v354_v26 = vld [vmem:[%s5531_s2] sm:$0xff]  ;;  %v357_v27 = vld [vmem:[%s5531_s2 + $0x18] sm:$0xff]  ;;  %v5598_v28 = vmov 0 }
  0x47   : > { %3326 = vmatpush1.msk.msra.mxu0 %vm395_vm3, %v345_v1  ;;  %3332 = vmatpush1.msk.msra.mxu1 %vm395_vm3, %v346_v2  ;;  %v4298_v11 = vsub.s32 0, %v596_v8  ;;  %v4300_v12 = vsub.s32 1, %v596_v8  ;;  %v4302_v13 = vsub.s32 2, %v596_v8  ;;  %v4304_v14 = vsub.s32 3, %v596_v8  ;;  %v352_v32 = vld [vmem:[%s5530_s1 + $0x10] sm:$0xff]  ;;  %v624_v36 = vld [vmem:[%s5535_s6] sm:$0xff] }
  0x48   : > { %3327 = vmatmul.mubr.msk.f32.vlgmr.msra.gmra.mrb[0].mxu0 %vm382_vm4, %v350_v7  ;;  %3333 = vmatmul.mubr.msk.f32.vlgmr.msra.gmra.mrb[0].mxu1 %vm382_vm4, %v350_v7  ;;  %v2800_v17 = vsel %vm2799_vm5, 1, %v4101_v9  ;;  %v625_v37 = vld [vmem:[%s5535_s6 + $0x8] sm:$0xff]  ;;  %v353_v38 = vld [vmem:[%s5530_s1 + $0x18] sm:$0xff]  ;;  %v4390_v39 = vld [vmem:[#allocation2] sm:$0xff]  ;;  %s4104_s12 = smov 124   ;;  %s4105_s19 = smov 21  }
  0x49   : > { %474 = vmatprep.mubr.f32.mxu0 %v5541_v6  ;;  %563 = vmatprep.mubr.f32.mxu1 %v5541_v6  ;;  %v2804_v19 = vrot.slane %v2800_v17, %v4298_v11  ;;  %v2808_v20 = vrot.slane %v2800_v17, %v4300_v12  ;;  %v2812_v21 = vrot.slane %v2800_v17, %v4302_v13  ;;  %v4394_v40 = vld [vmem:[#allocation3] sm:$0xff]  ;;  %s4106_s25 = smov 20   ;;  %s4107_s15 = smov 19   ;;  %vm5581_vm12 = vcmask 130048  }
  0x4a   : > { %v2816_v22 = vrot.slane %v2800_v17, %v4304_v14  ;;  %370 = vperm.xlu0 %3635, %v356_v15   ;;  %365 = vperm.xlu1 %3636, %v355_v16   ;;  %s4108_s20 = smov 1   ;;  %s5539_s21 = smov 109   ;;  %v598_v60 = vrot.slane %v4291_v10, %v4298_v11  ;;  %v606_v0 = vrot.slane %v4291_v10, %v4302_v13  ;;  %vm664_vm13 = vcmask 1031168  }
  0x4b   : > { %vm4323_vm7 = vcmp.eq.s32.totalorder %v2804_v19, 1  ;;  %vm4327_vm8 = vcmp.eq.s32.totalorder %v2808_v20, 1  ;;  %vm4331_vm9 = vcmp.eq.s32.totalorder %v2812_v21, 1  ;;  %s4110_s22 = smov 108   ;;  %v610_v8 = vrot.slane %v4291_v10, %v4304_v14  ;;  %s4114_s23 = smov 2  }
  0x4c   : > { %v5590_v23 = vsel %vm4323_vm7, 4294967295, %v5589_v23  ;;  %v5593_v24 = vsel %vm4327_vm8, 4294967295, %v5592_v24  ;;  %v5596_v25 = vsel %vm4331_vm9, 4294967295, %v5595_v25  ;;  %3328 = vmatmul.mubr.msk.f32.gmra.mrb[2].mxu0 %vm382_vm4, %v351_v18  ;;  %3334 = vmatmul.mubr.msk.f32.gmra.mrb[2].mxu1 %vm382_vm4, %v351_v18  ;;  %vm4343_vm10 = vcmp.eq.s32.totalorder %v2816_v22, 1  ;;  %s4115_s24 = smov 110   ;;  %p5699_p12 = scmp.ne.s32.totalorder %s5584_s17, 0 }
  0x4d   : > { %5591 = vst [vmem:[#allocation11_spill] sm:$0xff] %v5590_v23  ;;  %5594 = vst [vmem:[#allocation12_spill] sm:$0xff] %v5593_v24  ;;  %v5599_v28 = vsel %vm4343_vm10, 4294967295, %v5598_v28  ;;  %v4349_v29 = vsel %vm4323_vm7, %v345_v1, -inf  ;;  %v4353_v30 = vsel %vm4327_vm8, %v380_v4, -inf  ;;  %v4357_v31 = vsel %vm4331_vm9, %v346_v2, -inf  ;;  %480 = vmatprep.mubr.f32.mxu0 %v5541_v6  ;;  %569 = vmatprep.mubr.f32.mxu1 %v5541_v6 }
  0x4e   : > { %5597 = vst [vmem:[#allocation13_spill] sm:$0xff] %v5596_v25  ;;  %5600 = vst [vmem:[#allocation14_spill] sm:$0xff] %v5599_v28  ;;  %v4368_v33 = vsel %vm4343_vm10, %v381_v5, -inf  ;;  %v4372_v34 = vcombine.low %v4349_v29, %v4353_v30  ;;  %360 = vperm.xlu0 %3635, %v354_v26   ;;  %375 = vperm.xlu1 %3636, %v357_v27   ;;  %v4413_v46 = vcombine.low %v4353_v30, %v4353_v30  ;;  %v3324_v4 = vld [vmem:[%s5536_s7 + $0x1] ss:$2 sm:$0xf] }
  0x4f   : > { %v2832_v35 = vcombine.low %v4357_v31, %v4368_v33  ;;  %v602_v2 = vrot.slane %v4291_v10, %v4300_v12  ;;  %v1392_v17 = vrot.slane %v3324_v4, %v4302_v13  ;;  %v1384_v18 = vrot.slane %v3324_v4, %v4298_v11 }
  0x50   : > { %2835 = vst [vmem:[#allocation4 + $0x4] sm:$0xff] %v4372_v34  ;;  %3329 = vmatmul.mubr.msk.f32.gmra.mrb[4].mxu0 %vm382_vm4, %v352_v32  ;;  %3335 = vmatmul.mubr.msk.f32.gmra.mrb[4].mxu1 %vm382_vm4, %v352_v32  ;;  %v1388_v26 = vrot.slane %v3324_v4, %v4300_v12  ;;  %v1396_v27 = vrot.slane %v3324_v4, %v4304_v14  ;;  %vm652_vm14 = vcmask 1039360   ;;  %vm1472_vm15 = vcmask 1014784  }
  0x51   : > { %2838 = vst.msk [vmem:[#allocation4 + $0xc] sm:$0xff] %vm2837_vm11, %v2832_v35  ;;  %575 = vmatprep.mubr.f32.mxu1 %v5541_v6  ;;  %486 = vmatprep.mubr.f32.mxu0 %v5541_v6  ;;  %vm1460_vm0 = vcmask 1022976   ;;  %vm2579_vm1 = vcmask 736256   ;;  %vm2080_vm2 = vcmask 15360   ;;  %vm2332_vm5 = vcmask 900096  }
  0x52   : > { %628 = vperm.xlu0 %3635, %v624_v36   ;;  %633 = vperm.xlu1 %3636, %v625_v37   ;;  %vm694_vm6 = vcmask 171008   ;;  %vm950_vm11 = vcmask 7168  }
  0x54   : > { %3336 = vmatmul.mubr.msk.f32.gmra.mrb[6].mxu1 %vm382_vm4, %v353_v38  ;;  %3330 = vmatmul.mubr.msk.f32.gmra.mrb[6].mxu0 %vm382_vm4, %v353_v38 }
  0x55   : > { %864 = vmatprep.mubr.f32.mxu1 %v5541_v6  ;;  %787 = vmatprep.mubr.f32.mxu0 %v5541_v6 }
  0x56   : > { %656 = vrot.lane.b32.xlu0 %v4390_v39, %s4102_s16  ;;  %1980 = vrot.lane.b32.xlu1 %v4394_v40, %s4103_s10 }
  0x57   : > { %v2839_v41 = vld [vmem:[#allocation4] sm:$0xff] }
  0x58   : > { %v2840_v42 = vld [vmem:[#allocation4 + $0x8] sm:$0xff]  ;;  %v2843_v43 = vcombine.high %v2839_v41, %v2839_v41  ;;  %v2904_v45 = vld [vmem:[#allocation4 + $0x10] sm:$0xf] }
  0x59   : > { %v2844_v44 = vcombine.high %v2840_v42, %v2840_v42  ;;  %v2929_v47 = vld [vmem:[#allocation4 + $0xc] sm:$0xff] }
  0x5a   : > { %1464 = vrot.lane.b32.xlu0 %v4394_v40, %s4104_s12  ;;  %2849 = vrot.lane.b32.xlu1 %v2840_v42, %s4105_s19  ;;  %v4422_v48 = vcombine.high %v2929_v47, %v2929_v47 }
  0x5e   : > { %2847 = vrot.lane.b32.xlu0 %v2843_v43, %s4105_s19  ;;  %2851 = vrot.lane.b32.xlu1 %v2844_v44, %s4105_s19 }
  0x62   : > { %2845 = vrot.lane.b32.xlu0 %v2839_v41, %s4105_s19  ;;  %2868 = vrot.lane.b32.xlu1 %v2840_v42, %s4106_s25 }
  0x66   : > { %2866 = vrot.lane.b32.xlu0 %v2843_v43, %s4106_s25  ;;  %2870 = vrot.lane.b32.xlu1 %v2844_v44, %s4106_s25 }
  0x6a   : > { %2864 = vrot.lane.b32.xlu0 %v2839_v41, %s4106_s25  ;;  %2888 = vrot.lane.b32.xlu1 %v2840_v42, %s4107_s15  ;;  %s4111_s25 = smov 125  }
  0x6e   : > { %2886 = vrot.lane.b32.xlu0 %v2843_v43, %s4107_s15  ;;  %2890 = vrot.lane.b32.xlu1 %v2844_v44, %s4107_s15 }
  0x72   : > { %2884 = vrot.lane.b32.xlu0 %v2839_v41, %s4107_s15  ;;  %2910 = vrot.lane.b32.xlu1 %v2840_v42, %s4108_s20  ;;  %s4112_s15 = smov 42  }
  0x76   : > { %2908 = vrot.lane.b32.xlu0 %v2843_v43, %s4108_s20  ;;  %2914 = vrot.lane.b32.xlu1 %v2904_v45, %s4108_s20 }
  0x7a   : > { %2912 = vrot.lane.b32.xlu0 %v2844_v44, %s4108_s20  ;;  %2936 = vrot.lane.b32.xlu1 %v4413_v46, %s4103_s10 }
  0x7e   : > { %2906 = vrot.lane.b32.xlu0 %v2839_v41, %s4108_s20  ;;  %2934 = vrot.lane.b32.xlu1 %v4372_v34, %s4103_s10 }
  0x82   : > { %2938 = vrot.lane.b32.xlu0 %v2929_v47, %s4103_s10  ;;  %2955 = vrot.lane.b32.xlu1 %v4413_v46, %s5539_s21 }
  0x86   : > { %2940 = vrot.lane.b32.xlu0 %v4422_v48, %s4103_s10  ;;  %2953 = vrot.lane.b32.xlu1 %v4372_v34, %s5539_s21 }
  0x8a   : > { %2957 = vrot.lane.b32.xlu0 %v2929_v47, %s5539_s21  ;;  %2974 = vrot.lane.b32.xlu1 %v4413_v46, %s4110_s22 }
  0x8e   : > { %2959 = vrot.lane.b32.xlu0 %v4422_v48, %s5539_s21  ;;  %2972 = vrot.lane.b32.xlu1 %v4372_v34, %s4110_s22 }
  0x92   : > { %2976 = vrot.lane.b32.xlu0 %v2929_v47, %s4110_s22 }
  0x96   : > { %2978 = vrot.lane.b32.xlu0 %v4422_v48, %s4110_s22  ;;  %s4113_s22 = smov 22  }
  0xc9   : > { %v371_v57 = vpop.permute.xlu0 %370  ;;  %v4452_v58 = vpop.permute.xlu1 %365 }
  0xca   : > { %5609 = vst [vmem:[#allocation23_spill] sm:$0xff] %v4452_v58 }
  0xcd   : > { %v376_v16 = vpop.permute.xlu1 %375 }
 0x11b   : > { %v4436_v49 = vpop.f32.mrb[0].mxu0  ;;  %v4438_v50 = vpop.f32.mrb[0].mxu1 }
 0x11c   : > { %5601 = vst [vmem:[#allocation15_spill] sm:$0xff] %v4436_v49  ;;  %5602 = vst [vmem:[#allocation16_spill] sm:$0xff] %v4438_v50  ;;  %v4440_v51 = vpop.f32.mrb[1].mxu0  ;;  %v4442_v52 = vpop.f32.mrb[1].mxu1 }
 0x11d   : > { %5603 = vst [vmem:[#allocation17_spill] sm:$0xff] %v4440_v51  ;;  %5604 = vst [vmem:[#allocation18_spill] sm:$0xff] %v4442_v52 }
 0x11f   : > { %v4444_v53 = vpop.f32.mrb[2].mxu0  ;;  %v4446_v54 = vpop.f32.mrb[2].mxu1 }
 0x120   : > { %5605 = vst [vmem:[#allocation19_spill] sm:$0xff] %v4444_v53  ;;  %5606 = vst [vmem:[#allocation20_spill] sm:$0xff] %v4446_v54  ;;  %v4448_v55 = vpop.f32.mrb[3].mxu0  ;;  %v4450_v56 = vpop.f32.mrb[3].mxu1 }
 0x121   : > { %5607 = vst [vmem:[#allocation21_spill] sm:$0xff] %v4448_v55  ;;  %5608 = vst [vmem:[#allocation22_spill] sm:$0xff] %v4450_v56 }
 0x123   : > { %v482_v59 = vpop.f32.mrb[4].mxu0  ;;  %v571_v61 = vpop.f32.mrb[4].mxu1 }
 0x124   : > { %v483_v62 = vadd.f32 %v482_v59, %v371_v57  ;;  %v572_v63 = vadd.f32 %v571_v61, %v371_v57  ;;  %v484_v1 = vpop.f32.mrb[5].mxu0  ;;  %v573_v3 = vpop.f32.mrb[5].mxu1 }
 0x125   : > { %v485_v5 = vadd.f32 %v484_v1, %v371_v57  ;;  %v574_v7 = vadd.f32 %v573_v3, %v371_v57 }
 0x126   : > { %v590_v9 = vmax.f32 %v483_v62, 0.0  ;;  %v592_v15 = vmax.f32 %v572_v63, 0.0 }
 0x127   : > { %v591_v19 = vmax.f32 %v485_v5, 0.0  ;;  %v593_v20 = vmax.f32 %v574_v7, 0.0  ;;  %v577_v21 = vpop.f32.mrb[6].mxu1  ;;  %v488_v22 = vpop.f32.mrb[6].mxu0 }
 0x128   : > { %v615_v32 = vmul.f32 %v598_v60, %v590_v9  ;;  %v617_v34 = vmul.f32 %v606_v0, %v592_v15  ;;  %v578_v35 = vadd.f32 %v577_v21, %v376_v16  ;;  %v489_v10 = vadd.f32 %v488_v22, %v376_v16  ;;  %v490_v36 = vpop.f32.mrb[7].mxu0  ;;  %v579_v37 = vpop.f32.mrb[7].mxu1 }
 0x129   : > { %v616_v38 = vmul.f32 %v602_v2, %v591_v19  ;;  %v618_v41 = vmul.f32 %v610_v8, %v593_v20  ;;  %v491_v42 = vadd.f32 %v490_v36, %v376_v16  ;;  %v580_v13 = vadd.f32 %v579_v37, %v376_v16  ;;  %v4497_v2 = vpop.permute.xlu1 %633 }
 0x12a   : > { %658 = vrot.lane.b32.xlu1 %v615_v32, %s4102_s16  ;;  %v3637_v11 = vpack.i.bf16 %v615_v32, %v4390_v39  ;;  %v1378_v43 = vmax.f32 %v578_v35, 0.0  ;;  %v1376_v44 = vmax.f32 %v489_v10, 0.0  ;;  %v4482_v39 = vpop.permute.xlu0 %360  ;;  %5612 = vst [vmem:[#allocation26_spill] sm:$0xff] %v4497_v2 }
 0x12b   : > { %623 = vst.msk [vmem:[#allocation2 + $0x20] sm:$0xff] %vm5581_vm12, %v618_v41  ;;  %v3652_v12 = vpack.i.bf16 %v617_v34, %v616_v38  ;;  %v1377_v14 = vmax.f32 %v491_v42, 0.0  ;;  %v1379_v45 = vmax.f32 %v580_v13, 0.0  ;;  %v3662_v47 = vpack.i.bf16 %v616_v38, %v615_v32  ;;  %5610 = vst [vmem:[#allocation24_spill] sm:$0xff] %v4482_v39 }
 0x12c   : > { %3638 = vrot.lane.b32.xlu0 %v3637_v11, %s4103_s10  ;;  %v4473_v57 = vmul.f32 %v1392_v17, %v1378_v43  ;;  %v4475_v59 = vmul.f32 %v1384_v18, %v1376_v44 }
 0x12d   : > { %v4477_v60 = vmul.f32 %v1388_v26, %v1377_v14  ;;  %v1404_v61 = vmul.f32 %v1396_v27, %v1379_v45  ;;  %v4505_v4 = vpop.permute.xlu1 %1980 }
 0x12e   : > { %662 = vrot.lane.b32.xlu1 %v617_v34, %s4102_s16  ;;  %v4488_v63 = vpop.permute.xlu0 %628  ;;  %v3687_v5 = vpack.i.bf16 %v4394_v40, %v4473_v57  ;;  %v3702_v20 = vpack.i.bf16 %v4473_v57, %v4394_v40 }
 0x12f   : > { %1408 = vst.msk [vmem:[#allocation3 + $0x20] sm:$0xff] %vm5581_vm12, %v1404_v61  ;;  %5611 = vst [vmem:[#allocation25_spill] sm:$0xff] %v4488_v63  ;;  %v3787_v42 = vpack.i.bf16 %v4473_v57, %v4477_v60  ;;  %vm1554_vm12 = vcmask 326656  }
 0x130   : > { %3643 = vrot.lane.b32.xlu0 %v3637_v11, %s4105_s19 }
 0x131   : > { %v4514_v8 = vpop.permute.xlu1 %2849 }
 0x132   : > { %3653 = vrot.lane.b32.xlu1 %v3652_v12, %s4103_s10  ;;  %v4486_v62 = vld [vmem:[#allocation2 + $0x20] sm:$0xff]  ;;  %v4493_v1 = vpop.permute.xlu0 %656 }
 0x133   : > { %v3667_v0 = vpack.i.bf16 %v4486_v62, %v617_v34  ;;  %v3682_v15 = vpack.i.bf16 %v4486_v62, %v615_v32 }
 0x134   : > { %905 = vrot.lane.b32.xlu0 %v615_v32, %s4102_s16  ;;  %v3712_v32 = vpack.i.bf16 %v4477_v60, %v4475_v59 }
 0x135   : > { %v4522_v16 = vpop.permute.xlu1 %2851 }
 0x136   : > { %3658 = vrot.lane.b32.xlu1 %v3652_v12, %s4105_s19  ;;  %v4500_v3 = vpop.permute.xlu0 %1464  ;;  %v1974_v21 = vld [vmem:[#allocation3 + $0x20] sm:$0xff] }
 0x137   : > { %v3732_v27 = vpack.i.bf16 %v1974_v21, %v4473_v57 }
 0x138   : > { %909 = vrot.lane.b32.xlu0 %v617_v34, %s4102_s16 }
 0x139   : > { %v4531_v18 = vpop.permute.xlu1 %2868 }
 0x13a   : > { %3668 = vrot.lane.b32.xlu1 %v3667_v0, %s4103_s10  ;;  %v4510_v7 = vpop.permute.xlu0 %2847 }
 0x13c   : > { %3648 = vrot.lane.b32.xlu0 %v3637_v11, %s4108_s20 }
 0x13d   : > { %v4542_v22 = vpop.permute.xlu1 %2870 }
 0x13e   : > { %907 = vrot.lane.b32.xlu1 %v616_v38, %s4102_s16  ;;  %v4517_v9 = vpop.permute.xlu0 %2845 }
 0x140   : > { %660 = vrot.lane.b32.xlu0 %v616_v38, %s4102_s16  ;;  %v3782_v38 = vpack.i.bf16 %v1974_v21, %v4475_v59 }
 0x141   : > { %v4553_v34 = vpop.permute.xlu1 %2888 }
 0x142   : > { %911 = vrot.lane.b32.xlu1 %v4486_v62, %s4102_s16  ;;  %v4525_v17 = vpop.permute.xlu0 %2866  ;;  %5614 = vst [vmem:[#allocation28_spill] sm:$0xff] %v4553_v34 }
 0x144   : > { %3663 = vrot.lane.b32.xlu0 %v3662_v47, %s4103_s10 }
 0x145   : > { %v4560_v10 = vpop.permute.xlu1 %2890 }
 0x146   : > { %3673 = vrot.lane.b32.xlu1 %v3652_v12, %s4108_s20  ;;  %v4535_v19 = vpop.permute.xlu0 %2864  ;;  %5616 = vst [vmem:[#allocation30_spill] sm:$0xff] %v4560_v10 }
 0x148   : > { %3688 = vrot.lane.b32.xlu0 %v3687_v5, %s4103_s10 }
 0x149   : > { %v4567_v37 = vpop.permute.xlu1 %2910 }
 0x14a   : > { %3678 = vrot.lane.b32.xlu1 %v3652_v12, %s5539_s21  ;;  %v4546_v26 = vpop.permute.xlu0 %2886  ;;  %5618 = vst [vmem:[#allocation32_spill] sm:$0xff] %v4567_v37 }
 0x14b   : > { %5613 = vst [vmem:[#allocation27_spill] sm:$0xff] %v4546_v26 }
 0x14c   : > { %3693 = vrot.lane.b32.xlu0 %v3687_v5, %s4102_s16 }
 0x14d   : > { %v4577_v13 = vpop.permute.xlu1 %2914 }
 0x14e   : > { %3683 = vrot.lane.b32.xlu1 %v3682_v15, %s5539_s21  ;;  %v4556_v35 = vpop.permute.xlu0 %2884  ;;  %5620 = vst [vmem:[#allocation34_spill] sm:$0xff] %v4577_v13  ;;  %s4116_s21 = smov 90  }
 0x14f   : > { %5615 = vst [vmem:[#allocation29_spill] sm:$0xff] %v4556_v35 }
 0x150   : > { %3698 = vrot.lane.b32.xlu0 %v3687_v5, %s4111_s25 }
 0x151   : > { %v4584_v43 = vpop.permute.xlu1 %2936 }
 0x152   : > { %1466 = vrot.lane.b32.xlu1 %v4475_v59, %s4104_s12  ;;  %v4563_v36 = vpop.permute.xlu0 %2908  ;;  %5622 = vst [vmem:[#allocation36_spill] sm:$0xff] %v4584_v43 }
 0x153   : > { %5617 = vst [vmem:[#allocation31_spill] sm:$0xff] %v4563_v36 }
 0x154   : > { %2016 = vrot.lane.b32.xlu0 %v4475_v59, %s4104_s12 }
 0x155   : > { %v4591_v12 = vpop.permute.xlu1 %2934 }
 0x156   : > { %1470 = vrot.lane.b32.xlu1 %v4473_v57, %s4104_s12  ;;  %v4571_v41 = vpop.permute.xlu0 %2912  ;;  %5624 = vst [vmem:[#allocation38_spill] sm:$0xff] %v4591_v12 }
 0x157   : > { %5619 = vst [vmem:[#allocation33_spill] sm:$0xff] %v4571_v41 }
 0x158   : > { %2020 = vrot.lane.b32.xlu0 %v4473_v57, %s4104_s12 }
 0x159   : > { %v4596_v45 = vpop.permute.xlu1 %2955 }
 0x15a   : > { %3703 = vrot.lane.b32.xlu1 %v3702_v20, %s4112_s15  ;;  %v4580_v11 = vpop.permute.xlu0 %2906  ;;  %5626 = vst [vmem:[#allocation40_spill] sm:$0xff] %v4596_v45 }
 0x15b   : > { %5621 = vst [vmem:[#allocation35_spill] sm:$0xff] %v4580_v11 }
 0x15c   : > { %1468 = vrot.lane.b32.xlu0 %v4477_v60, %s4104_s12 }
 0x15d   : > { %v4602_v57 = vpop.permute.xlu1 %2953 }
 0x15e   : > { %3708 = vrot.lane.b32.xlu1 %v3702_v20, %s4113_s22  ;;  %v4588_v44 = vpop.permute.xlu0 %2938  ;;  %5628 = vst [vmem:[#allocation42_spill] sm:$0xff] %v4602_v57 }
 0x15f   : > { %5623 = vst [vmem:[#allocation37_spill] sm:$0xff] %v4588_v44 }
 0x160   : > { %3733 = vrot.lane.b32.xlu0 %v3732_v27, %s4103_s10 }
 0x162   : > { %3713 = vrot.lane.b32.xlu1 %v3712_v32, %s4103_s10  ;;  %v4593_v14 = vpop.permute.xlu0 %2940 }
 0x163   : > { %5625 = vst [vmem:[#allocation39_spill] sm:$0xff] %v4593_v14 }
 0x164   : > { %3738 = vrot.lane.b32.xlu0 %v3712_v32, %s4102_s16 }
 0x166   : > { %3718 = vrot.lane.b32.xlu1 %v3712_v32, %s4102_s16  ;;  %v4599_v47 = vpop.permute.xlu0 %2957 }
 0x167   : > { %5627 = vst [vmem:[#allocation41_spill] sm:$0xff] %v4599_v47 }
 0x168   : > { %3748 = vrot.lane.b32.xlu0 %v3712_v32, %s4111_s25 }
 0x16a   : > { %3723 = vrot.lane.b32.xlu1 %v3712_v32, %s4111_s25  ;;  %v4604_v59 = vpop.permute.xlu0 %2959 }
 0x16b   : > { %5629 = vst [vmem:[#allocation43_spill] sm:$0xff] %v4604_v59 }
 0x16c   : > { %3773 = vrot.lane.b32.xlu0 %v3732_v27, %s4114_s23 }
 0x16e   : > { %3728 = vrot.lane.b32.xlu1 %v3712_v32, %s4103_s10  ;;  %v4609_v61 = vpop.permute.xlu0 %2976 }
 0x16f   : > { %5631 = vst [vmem:[#allocation45_spill] sm:$0xff] %v4609_v61 }
 0x170   : > { %3783 = vrot.lane.b32.xlu0 %v3782_v38, %s4115_s24 }
 0x172   : > { %3743 = vrot.lane.b32.xlu1 %v3732_v27, %s4102_s16  ;;  %v4613_v5 = vpop.permute.xlu0 %2978  ;;  %s5634_s16 = smov 109  }
 0x173   : > { %5633 = vst [vmem:[#allocation47_spill] sm:$0xff] %v4613_v5 }
 0x174   : > { %3788 = vrot.lane.b32.xlu0 %v3787_v42, %s4116_s21 }
 0x176   : > { %3753 = vrot.lane.b32.xlu1 %v3732_v27, %s4111_s25 }
 0x178   : > { %3793 = vrot.lane.b32.xlu0 %v3782_v38, %s4116_s21 }
 0x17a   : > { %2018 = vrot.lane.b32.xlu1 %v4477_v60, %s4104_s12  ;;  %v4607_v60 = vpop.permute.xlu1 %2974 }
 0x17b   : > { %5630 = vst [vmem:[#allocation44_spill] sm:$0xff] %v4607_v60 }
 0x17e   : > { %2022 = vrot.lane.b32.xlu1 %v1974_v21, %s4104_s12  ;;  %v4611_v0 = vpop.permute.xlu1 %2972  ;;  %s3399_s12 = sshll.u32 %s4187_s9, 10 }
 0x17f   : > { %5632 = vst [vmem:[#allocation46_spill] sm:$0xff] %v4611_v0  ;;  %s5478_s25 = scalar_lea.hbm %s5537_s8, %s3399_s12 }
 0x182   : > { %3758 = vrot.lane.b32.xlu1 %v3712_v32, %s4112_s15 }
 0x186   : > { %3763 = vrot.lane.b32.xlu1 %v3712_v32, %s4113_s22 }
 0x18a   : > { %3768 = vrot.lane.b32.xlu1 %v3712_v32, %s4114_s23 }
 0x18e   : > { %3778 = vrot.lane.b32.xlu1 %v3787_v42, %s4115_s24 }
 0x19c   : > { %v659_v15 = vpop.permute.xlu1 %658 }
 0x19d   : > { %v665_v2 = vsel %vm664_vm13, %v4493_v1, %v659_v15 }
 0x19e   : > { %v3639_v20 = vpop.permute.xlu0 %3638 }
 0x19f   : > { %v3641_v58 = vunpack.i.h.bf16 %v3639_v20  ;;  %v3640_v63 = vunpack.i.l.bf16 %v3639_v20 }
 0x1a0   : > { %v663_v21 = vpop.permute.xlu1 %662 }
 0x1a1   : > { %692 = vrot.lane.b32.xlu1 %v663_v21, %s4105_s19  ;;  %v653_v39 = vsel %vm652_vm14, %v3640_v63, %v3641_v58 }
 0x1a2   : > { %v4616_v27 = vpop.permute.xlu0 %3643 }
 0x1a4   : > { %v3654_v32 = vpop.permute.xlu1 %3653 }
 0x1a5   : > { %v3655_v54 = vunpack.i.l.bf16 %v3654_v32  ;;  %v3656_v20 = vunpack.i.h.bf16 %v3654_v32 }
 0x1a6   : > { %v906_v38 = vpop.permute.xlu0 %905 }
 0x1a7   : > { %940 = vrot.lane.b32.xlu0 %v906_v38, %s4108_s20  ;;  %v654_v50 = vsel %vm652_vm14, %v3641_v58, %v3655_v54 }
 0x1a8   : > { %v4619_v42 = vpop.permute.xlu1 %3658 }
 0x1aa   : > { %v910_v6 = vpop.permute.xlu0 %909 }
 0x1ab   : > { %686 = vrot.lane.b32.xlu0 %v665_v2, %s4105_s19  ;;  %v3802_v2 = vpack.i.bf16 %v654_v50, %v653_v39  ;;  %v655_v39 = vsel %vm652_vm14, %v3655_v54, %v3656_v20 }
 0x1ac   : > { %v3669_v56 = vpop.permute.xlu1 %3668 }
 0x1ad   : > { %v3671_v1 = vunpack.i.h.bf16 %v3669_v56  ;;  %v3670_v50 = vunpack.i.l.bf16 %v3669_v56 }
 0x1ae   : > { %v4624_v55 = vpop.permute.xlu0 %3648 }
 0x1b0   : > { %v908_v53 = vpop.permute.xlu1 %907 }
 0x1b2   : > { %v661_v52 = vpop.permute.xlu0 %660 }
 0x1b3   : > { %v667_v59 = vsel %vm664_vm13, %v661_v52, %v663_v21  ;;  %v3807_v21 = vpack.i.bf16 %v3656_v20, %v655_v39  ;;  %v913_v20 = vsel %vm664_vm13, %v906_v38, %v908_v53  ;;  %v914_v39 = vsel %vm664_vm13, %v908_v53, %v910_v6 }
 0x1b4   : > { %v912_v51 = vpop.permute.xlu1 %911 }
 0x1b5   : > { %1168 = vrot.lane.b32.xlu0 %v912_v51, %s5634_s16 }
 0x1b6   : > { %v3664_v49 = vpop.permute.xlu0 %3663 }
 0x1b7   : > { %v3665_v25 = vunpack.i.l.bf16 %v3664_v49  ;;  %v3666_v28 = vunpack.i.h.bf16 %v3664_v49 }
 0x1b8   : > { %v4629_v23 = vpop.permute.xlu1 %3673 }
 0x1b9   : > { %3803 = vrot.lane.b32.xlu0 %v3802_v2, %s4105_s19  ;;  %v3797_v24 = vpack.i.bf16 %v3665_v25, %v3671_v1  ;;  %v902_v58 = vsel %vm652_vm14, %v3665_v25, %v3666_v28  ;;  %v904_v25 = vsel %vm652_vm14, %v3670_v50, %v3671_v1  ;;  %v3676_v26 = vunpack.i.h.bf16 %v4629_v23 }
 0x1ba   : > { %v4632_v5 = vpop.permute.xlu0 %3688  ;;  %v3812_v63 = vpack.i.bf16 %v902_v58, %v4486_v62  ;;  %v666_v62 = vsel %vm664_vm13, %v659_v15, %v661_v52 }
 0x1bb   : > { %3798 = vrot.lane.b32.xlu1 %v3797_v24, %s4108_s20  ;;  %v903_v24 = vsel %vm652_vm14, %v3666_v28, %v3670_v50  ;;  %v3690_v43 = vunpack.i.l.bf16 %v4632_v5 }
 0x1bc   : > { %v4635_v61 = vpop.permute.xlu1 %3678  ;;  %v3822_v56 = vpack.i.bf16 %v904_v25, %v903_v24  ;;  %v915_v24 = vsel %vm664_vm13, %v910_v6, %v912_v51 }
 0x1bd   : > { %690 = vrot.lane.b32.xlu0 %v667_v59, %s4105_s19 }
 0x1be   : > { %v4640_v49 = vpop.permute.xlu0 %3693 }
 0x1bf   : > { %948 = vrot.lane.b32.xlu1 %v912_v51, %s4108_s20  ;;  %v3696_v25 = vunpack.i.h.bf16 %v4640_v49 }
 0x1c0   : > { %v4645_v32 = vpop.permute.xlu1 %3683 }
 0x1c1   : > { %3813 = vrot.lane.b32.xlu0 %v3812_v63, %s4108_s20 }
 0x1c2   : > { %v4649_v2 = vpop.permute.xlu0 %3698 }
 0x1c3   : > { %3808 = vrot.lane.b32.xlu1 %v3807_v21, %s4105_s19  ;;  %v3827_v21 = vpack.i.bf16 %v3671_v1, %v902_v58 }
 0x1c4   : > { %v4653_v59 = vpop.permute.xlu1 %1466 }
 0x1c5   : > { %3818 = vrot.lane.b32.xlu0 %v3822_v56, %s4108_s20 }
 0x1c6   : > { %v4656_v54 = vpop.permute.xlu0 %2016 }
 0x1c7   : > { %688 = vrot.lane.b32.xlu1 %v666_v62, %s4105_s19  ;;  %s4117_s19 = smov 107  }
 0x1c8   : > { %v4660_v28 = vpop.permute.xlu1 %1470 }
 0x1c9   : > { %942 = vrot.lane.b32.xlu0 %v913_v20, %s4108_s20 }
 0x1ca   : > { %v4664_v50 = vpop.permute.xlu0 %2020 }
 0x1cb   : > { %944 = vrot.lane.b32.xlu1 %v914_v39, %s4108_s20 }
 0x1cc   : > { %v4668_v63 = vpop.permute.xlu1 %3703 }
 0x1cd   : > { %946 = vrot.lane.b32.xlu0 %v915_v24, %s4108_s20 }
 0x1ce   : > { %v4672_v52 = vpop.permute.xlu0 %1468 }
 0x1cf   : > { %1164 = vrot.lane.b32.xlu1 %v914_v39, %s5634_s16 }
 0x1d0   : > { %v4675_v15 = vpop.permute.xlu1 %3708 }
 0x1d1   : > { %3823 = vrot.lane.b32.xlu0 %v3822_v56, %s5634_s16  ;;  %v3695_v56 = vunpack.i.l.bf16 %v4640_v49 }
 0x1d2   : > { %v4678_v38 = vpop.permute.xlu0 %3733 }
 0x1d3   : > { %1162 = vrot.lane.b32.xlu1 %v913_v20, %s5634_s16 }
 0x1d4   : > { %v4681_v53 = vpop.permute.xlu1 %3713 }
 0x1d5   : > { %3828 = vrot.lane.b32.xlu0 %v3827_v21, %s5634_s16 }
 0x1d6   : > { %v4684_v6 = vpop.permute.xlu0 %3738 }
 0x1d7   : > { %2070 = vrot.lane.b32.xlu1 %v4656_v54, %s4114_s23  ;;  %v5561_v60 = vunpack.i.l.bf16 %v4684_v6 }
 0x1d8   : > { %v3719_v51 = vpop.permute.xlu1 %3718 }
 0x1d9   : > { %v3720_v62 = vunpack.i.l.bf16 %v3719_v51  ;;  %1166 = vrot.lane.b32.xlu0 %v915_v24, %s5634_s16  ;;  %v3715_v24 = vunpack.i.l.bf16 %v4681_v53 }
 0x1da   : > { %v4691_v1 = vpop.permute.xlu0 %3748 }
 0x1db   : > { %v1449_v58 = vsel %vm664_vm13, %v3696_v25, %v3720_v62  ;;  %v5560_v0 = vunpack.i.l.bf16 %v4691_v1  ;;  %v1473_v25 = vsel %vm1472_vm15, %v4500_v3, %v4653_v59  ;;  %v3701_v3 = vunpack.i.h.bf16 %v4649_v2 }
 0x1dc   : > { %v3842_v20 = vpack.i.bf16 %v3695_v56, %v1449_v58  ;;  %v4694_v39 = vpop.permute.xlu1 %3723  ;;  %v3691_v58 = vunpack.i.h.bf16 %v4632_v5 }
 0x1dd   : > { %1516 = vrot.lane.b32.xlu0 %v4660_v28, %s4112_s15  ;;  %v3832_v57 = vpack.i.bf16 %v5560_v0, %v5561_v60  ;;  %v3725_v45 = vunpack.i.l.bf16 %v4694_v39 }
 0x1de   : > { %v4698_v21 = vpop.permute.xlu0 %3773  ;;  %3843 = vrot.lane.b32.xlu1 %v3842_v20, %s4112_s15  ;;  %v1438_v14 = vsel %vm652_vm14, %v3691_v58, %v3715_v24  ;;  %v3700_v58 = vunpack.i.l.bf16 %v4649_v2 }
 0x1df   : > { %v1461_v0 = vsel %vm1460_vm0, %v3701_v3, %v3725_v45  ;;  %v3837_v60 = vpack.i.bf16 %v3690_v43, %v1438_v14 }
 0x1e0   : > { %v4703_v49 = vpop.permute.xlu1 %3728  ;;  %v3847_v11 = vpack.i.bf16 %v3700_v58, %v1461_v0 }
 0x1e1   : > { %1764 = vrot.lane.b32.xlu0 %v4660_v28, %s4113_s22  ;;  %v3730_v44 = vunpack.i.l.bf16 %v4703_v49 }
 0x1e2   : > { %v4712_v47 = vpop.permute.xlu0 %3783  ;;  %1510 = vrot.lane.b32.xlu1 %v1473_v25, %s4112_s15 }
 0x1e3   : > { %v1990_v5 = vsel %vm652_vm14, %v4505_v4, %v3730_v44  ;;  %v3721_v4 = vunpack.i.h.bf16 %v3719_v51 }
 0x1e4   : > { %v4721_v12 = vpop.permute.xlu1 %3743  ;;  %v3867_v3 = vpack.i.bf16 %v1990_v5, %v4394_v40 }
 0x1e5   : > { %3833 = vrot.lane.b32.xlu0 %v3832_v57, %s4114_s23  ;;  %v1450_v51 = vsel %vm664_vm13, %v3720_v62, %v3721_v4  ;;  %v1451_v5 = vsel %vm664_vm13, %v3721_v4, %v3695_v56  ;;  %v3726_v62 = vunpack.i.h.bf16 %v4694_v39  ;;  %v3731_v4 = vunpack.i.h.bf16 %v4703_v49 }
 0x1e6   : > { %v4727_v13 = vpop.permute.xlu0 %3788  ;;  %3858 = vrot.lane.b32.xlu1 %v3842_v20, %s4113_s22 }
 0x1e7   : > { %5635 = vst [vmem:[#allocation48_spill] sm:$0xff] %v4727_v13  ;;  %v5567_v57 = vunpack.i.h.bf16 %v4727_v13  ;;  %v5565_v20 = vunpack.i.l.bf16 %v4727_v13  ;;  %v1462_v39 = vsel %vm1460_vm0, %v3725_v45, %v3726_v62  ;;  %v4809_v45 = vunpack.i.h.bf16 %v4721_v12 }
 0x1e8   : > { %v4732_v41 = vpop.permute.xlu1 %3753 }
 0x1e9   : > { %3838 = vrot.lane.b32.xlu0 %v3837_v60, %s4112_s15 }
 0x1ea   : > { %v4737_v36 = vpop.permute.xlu0 %3793  ;;  %1758 = vrot.lane.b32.xlu1 %v1473_v25, %s4113_s22 }
 0x1eb   : > { %5636 = vst [vmem:[#allocation49_spill] sm:$0xff] %v4737_v36  ;;  %v5566_v14 = vunpack.i.h.bf16 %v4737_v36  ;;  %v3795_v2 = vunpack.i.l.bf16 %v4737_v36  ;;  %v5641_v36 = vunpack.i.l.bf16 %v4691_v1 }
 0x1ec   : > { %v4745_v37 = vpop.permute.xlu1 %2018 }
 0x1ed   : > { %v4750_v0 = vsel %vm2579_vm1, %v3795_v2, %v5565_v20  ;;  %v4757_v25 = vsel %vm2579_vm1, %v5567_v57, %v5566_v14  ;;  %3848 = vrot.lane.b32.xlu0 %v3847_v11, %s4112_s15  ;;  %v3877_v2 = vpack.i.bf16 %v1451_v5, %v1450_v51  ;;  %v5568_v51 = vunpack.i.l.bf16 %v4698_v21 }
 0x1ee   : > { %5637 = vst [vmem:[#allocation50_spill] sm:$0xff] %v4750_v0  ;;  %5638 = vst [vmem:[#allocation51_spill] sm:$0xff] %v4757_v25  ;;  %3868 = vrot.lane.b32.xlu1 %v3867_v3, %s4114_s23  ;;  %v3716_v3 = vunpack.i.h.bf16 %v4681_v53  ;;  %v5572_v25 = vunpack.i.h.bf16 %v4712_v47 }
 0x1f0   : > { %v4761_v40 = vpop.permute.xlu1 %2022  ;;  %v1439_v56 = vsel %vm652_vm14, %v3715_v24, %v3716_v3 }
 0x1f1   : > { %3853 = vrot.lane.b32.xlu0 %v3837_v60, %s4113_s22  ;;  %v1474_v60 = vsel %vm1472_vm15, %v4653_v59, %v4672_v52  ;;  %v3735_v59 = vunpack.i.l.bf16 %v4678_v38 }
 0x1f2   : > { %2330 = vrot.lane.b32.xlu1 %v4761_v40, %s4115_s24 }
 0x1f3   : > { %v1992_v57 = vsel %vm652_vm14, %v3731_v4, %v3735_v59 }
 0x1f4   : > { %v4768_v20 = vpop.permute.xlu1 %3758 }
 0x1f5   : > { %3863 = vrot.lane.b32.xlu0 %v3847_v11, %s4113_s22  ;;  %v1440_v11 = vsel %vm652_vm14, %v3716_v3, %v3690_v43  ;;  %v1463_v43 = vsel %vm1460_vm0, %v3726_v62, %v3700_v58  ;;  %v1991_v3 = vsel %vm652_vm14, %v3730_v44, %v3731_v4  ;;  %v3745_v58 = vunpack.i.l.bf16 %v4721_v12 }
 0x1f6   : > { %3878 = vrot.lane.b32.xlu1 %v3877_v2, %s4112_s15  ;;  %v3872_v49 = vpack.i.bf16 %v1440_v11, %v1439_v56  ;;  %v3882_v44 = vpack.i.bf16 %v1463_v43, %v1462_v39  ;;  %v3902_v11 = vpack.i.bf16 %v1992_v57, %v1991_v3  ;;  %v1475_v39 = vsel %vm1472_vm15, %v4672_v52, %v4660_v28 }
 0x1f7   : > { %v2004_v4 = vsel %vm664_vm13, %v3745_v58, %v4809_v45  ;;  %v4857_v52 = vsel %vm1472_vm15, %v4664_v50, %v4761_v40 }
 0x1f8   : > { %v4773_v14 = vpop.permute.xlu1 %3763  ;;  %v3917_v43 = vpack.i.bf16 %v4809_v45, %v2004_v4 }
 0x1f9   : > { %2078 = vrot.lane.b32.xlu0 %v4761_v40, %s4114_s23 }
 0x1fa   : > { %1512 = vrot.lane.b32.xlu1 %v1474_v60, %s4112_s15 }
 0x1fc   : > { %v4785_v53 = vpop.permute.xlu1 %3768 }
 0x1fd   : > { %v5569_v5 = vunpack.i.h.bf16 %v4785_v53  ;;  %2577 = vrot.lane.b32.xlu0 %v4761_v40, %s4116_s21 }
 0x1fe   : > { %3893 = vrot.lane.b32.xlu1 %v3877_v2, %s4113_s22  ;;  %v3785_v2 = vunpack.i.l.bf16 %v4712_v47 }
 0x1ff   : > { %v4800_v24 = vsel %vm2080_vm2, %v5569_v5, %v5568_v51  ;;  %v3756_v5 = vunpack.i.h.bf16 %v4732_v41 }
 0x200   : > { %v4806_v0 = vpop.permute.xlu1 %3778 }
 0x201   : > { %v5571_v62 = vunpack.i.h.bf16 %v4806_v0  ;;  %v5570_v51 = vunpack.i.l.bf16 %v4806_v0  ;;  %3873 = vrot.lane.b32.xlu0 %v3872_v49, %s4112_s15 }
 0x202   : > { %1760 = vrot.lane.b32.xlu1 %v1474_v60, %s4113_s22  ;;  %v3755_v60 = vunpack.i.l.bf16 %v4732_v41  ;;  %v3736_v41 = vunpack.i.h.bf16 %v4678_v38  ;;  %v3741_v38 = vunpack.i.h.bf16 %v4684_v6 }
 0x203   : > { %v4819_v56 = vsel %vm2332_vm5, %v3785_v2, %v5570_v51  ;;  %v4826_v12 = vsel %vm2332_vm5, %v5571_v62, %v5572_v25 }
 0x204   : > { %5639 = vst [vmem:[#allocation52_spill] sm:$0xff] %v4819_v56  ;;  %v2015_v2 = vsel %vm1460_vm0, %v3755_v60, %v3756_v5  ;;  %v1993_v28 = vsel %vm652_vm14, %v3735_v59, %v3736_v41 }
 0x205   : > { %3883 = vrot.lane.b32.xlu0 %v3882_v44, %s4112_s15  ;;  %v3927_v51 = vpack.i.bf16 %v3756_v5, %v2015_v2 }
 0x206   : > { %3903 = vrot.lane.b32.xlu1 %v3902_v11, %s4114_s23  ;;  %v4847_v11 = vsel %vm1472_vm15, %v4656_v54, %v4745_v37  ;;  %v3751_v54 = vunpack.i.h.bf16 %v4691_v1  ;;  %v3932_v1 = vpack.i.bf16 %v1993_v28, %v1992_v57  ;;  %v3661_v57 = vunpack.i.h.bf16 %v4619_v42 }
 0x208   : > { %v2014_v59 = vsel %vm1460_vm0, %v3751_v54, %v3755_v60 }
 0x209   : > { %1514 = vrot.lane.b32.xlu0 %v1475_v39, %s4112_s15  ;;  %v3947_v62 = vpack.i.bf16 %v2015_v2, %v2014_v59  ;;  %v2025_v2 = vsel %vm1472_vm15, %v4745_v37, %v4664_v50  ;;  %vm1170_vm15 = vcmask 891904  }
 0x20a   : > { %3918 = vrot.lane.b32.xlu1 %v3917_v43, %s4114_s23 }
 0x20d   : > { %3888 = vrot.lane.b32.xlu0 %v3872_v49, %s4113_s22  ;;  %v2003_v49 = vsel %vm664_vm13, %v3741_v38, %v3745_v58 }
 0x20e   : > { %3928 = vrot.lane.b32.xlu1 %v3927_v51, %s4114_s23  ;;  %v3907_v51 = vpack.i.bf16 %v3736_v41, %v1993_v28 }
 0x211   : > { %3898 = vrot.lane.b32.xlu0 %v3882_v44, %s4113_s22  ;;  %v3937_v44 = vpack.i.bf16 %v3736_v41, %v1991_v3  ;;  %v2013_v3 = vsel %vm1460_vm0, %v5641_v36, %v3751_v54  ;;  %vm1518_vm0 = vcmask 343040  }
 0x212   : > { %2072 = vrot.lane.b32.xlu1 %v4847_v11, %s4114_s23  ;;  %v3922_v58 = vpack.i.bf16 %v2014_v59, %v2013_v3  ;;  %v3957_v60 = vpack.i.bf16 %v3756_v5, %v2013_v3 }
 0x213   : > { %v4889_v41 = vpop.permute.xlu1 %692 }
 0x215   : > { %1762 = vrot.lane.b32.xlu0 %v1475_v39, %s4113_s22  ;;  %v5640_v39 = vunpack.i.l.bf16 %v4684_v6  ;;  %s4118_s22 = smov [#allocation8]  }
 0x216   : > { %2076 = vrot.lane.b32.xlu1 %v4857_v52, %s4114_s23 }
 0x217   : > { %v2002_v40 = vsel %vm664_vm13, %v5640_v39, %v3741_v38  ;;  %v3942_v38 = vpack.i.bf16 %v2004_v4, %v2003_v49  ;;  %v3660_v4 = vunpack.i.l.bf16 %v4619_v42  ;;  %vm716_vm13 = vcmask 195584  }
 0x218   : > { %v3912_v43 = vpack.i.bf16 %v2003_v49, %v2002_v40  ;;  %v4898_v50 = vpack.i.bf16 %v4809_v45, %v2002_v40  ;;  %v3645_v45 = vunpack.i.l.bf16 %v4616_v27 }
 0x219   : > { %3908 = vrot.lane.b32.xlu0 %v3907_v51, %s4114_s23  ;;  %v4870_v25 = vpop.permute.xlu0 %940 }
 0x21a   : > { %3938 = vrot.lane.b32.xlu1 %v3937_v44, %s4115_s24 }
 0x21d   : > { %3913 = vrot.lane.b32.xlu0 %v3912_v43, %s4114_s23  ;;  %v4879_v6 = vpop.permute.xlu0 %686 }
 0x21e   : > { %3948 = vrot.lane.b32.xlu1 %v3947_v62, %s4115_s24 }
 0x221   : > { %3923 = vrot.lane.b32.xlu0 %v3922_v58, %s4114_s23 }
 0x222   : > { %3958 = vrot.lane.b32.xlu1 %v3957_v60, %s4115_s24 }
 0x225   : > { %2074 = vrot.lane.b32.xlu0 %v2025_v2, %s4114_s23  ;;  %s4034_s23 = sshll.u32 %s4118_s22, 4  ;;  %s4035_s23 = int_to_ptr.vmem [resolvable:$false] %s4034_s23 }
 0x226   : > { %2328 = vrot.lane.b32.xlu1 %v4857_v52, %s4115_s24 }
 0x227   : > { %v4887_v36 = vpop.permute.xlu0 %1168 }
 0x229   : > { %3933 = vrot.lane.b32.xlu0 %v3932_v1, %s4115_s24 }
 0x22a   : > { %3963 = vrot.lane.b32.xlu1 %v3932_v1, %s4116_s21 }
 0x22b   : > { %v3804_v5 = vpop.permute.xlu0 %3803 }
 0x22c   : > { %v3806_v28 = vunpack.i.h.bf16 %v3804_v5  ;;  %v3805_v49 = vunpack.i.l.bf16 %v3804_v5 }
 0x22d   : > { %v4893_v54 = vpop.permute.xlu1 %3798  ;;  %3943 = vrot.lane.b32.xlu0 %v3942_v38, %s4115_s24 }
 0x22e   : > { %3968 = vrot.lane.b32.xlu1 %v3937_v44, %s4116_s21  ;;  %v3646_v44 = vunpack.i.h.bf16 %v4616_v27  ;;  %v698_v42 = vsel %vm694_vm6, %v3805_v49, %v3806_v28  ;;  %v3800_v34 = vunpack.i.l.bf16 %v4893_v54 }
 0x22f   : > { %v691_v37 = vpop.permute.xlu0 %690 }
 0x230   : > { %v696_v58 = vsel %vm694_vm6, %v3646_v44, %v3660_v4  ;;  %v695_v49 = vsel %vm694_vm6, %v3645_v45, %v3646_v44 }
 0x231   : > { %v4900_v51 = vpop.permute.xlu1 %948  ;;  %3953 = vrot.lane.b32.xlu0 %v4898_v50, %s4115_s24 }
 0x232   : > { %3978 = vrot.lane.b32.xlu1 %v3947_v62, %s4116_s21  ;;  %v697_v62 = vsel %vm694_vm6, %v3660_v4, %v3661_v57  ;;  %v3675_v4 = vunpack.i.l.bf16 %v4629_v23 }
 0x233   : > { %v3814_v59 = vpop.permute.xlu0 %3813 }
 0x234   : > { %v3815_v1 = vunpack.i.l.bf16 %v3814_v59  ;;  %v3816_v56 = vunpack.i.h.bf16 %v3814_v59 }
 0x235   : > { %v3809_v39 = vpop.permute.xlu1 %3808  ;;  %2326 = vrot.lane.b32.xlu0 %v2025_v2, %s4115_s24 }
 0x236   : > { %v3811_v40 = vunpack.i.h.bf16 %v3809_v39  ;;  %v3810_v43 = vunpack.i.l.bf16 %v3809_v39  ;;  %3988 = vrot.lane.b32.xlu1 %v3957_v60, %s4116_s21  ;;  %v954_v23 = vsel %vm950_vm11, %v3676_v26, %v3815_v1 }
 0x237   : > { %v3819_v3 = vpop.permute.xlu0 %3818 }
 0x238   : > { %v3404_v5 = vpack.c.bf16 %v3811_v40, %v3661_v57  ;;  %v700_v13 = vsel %vm694_vm6, %v3810_v43, %v3811_v40  ;;  %v3821_v10 = vunpack.i.h.bf16 %v3819_v3  ;;  %v3820_v35 = vunpack.i.l.bf16 %v3819_v3 }
 0x239   : > { %v3406_v27 = vpack.c.bf16 %v700_v13, %v697_v62  ;;  %v689_v39 = vpop.permute.xlu1 %688  ;;  %2324 = vrot.lane.b32.xlu0 %v4847_v11, %s4115_s24  ;;  %v699_v60 = vsel %vm694_vm6, %v3806_v28, %v3810_v43  ;;  %v3402_v40 = vpack.c.bf16 %v698_v42, %v695_v49  ;;  %v3651_v3 = vunpack.i.h.bf16 %v4624_v55  ;;  %s4036_s24 = scalar_lea.vmem %s4035_s23, 2048 }
 0x23a   : > { %2573 = vrot.lane.b32.xlu1 %v2025_v2, %s4116_s21  ;;  %3405 = vmatprep.subr.bf16.mxu1 %v3404_v5  ;;  %v3400_v57 = vpack.c.bf16 %v699_v60, %v696_v58  ;;  %v958_v62 = vsel %vm950_vm11, %v3821_v10, %v3800_v34  ;;  %v3650_v28 = vunpack.i.l.bf16 %v4624_v55  ;;  %v3801_v2 = vunpack.i.h.bf16 %v4893_v54  ;;  %v668_v55 = vld [vmem:[%s5532_s3] sm:$0xff] }
 0x23b   : > { %3407 = vmatpush1.bf16.msra.mxu1 %v3406_v27  ;;  %v4923_v13 = vpop.permute.xlu0 %942  ;;  %v957_v44 = vsel %vm950_vm11, %v3820_v35, %v3821_v10  ;;  %v702_v34 = vsel %vm694_vm6, %v689_v39, %v691_v37  ;;  %v956_v45 = vsel %vm950_vm11, %v3816_v56, %v3820_v35  ;;  %v703_v43 = vsel %vm694_vm6, %v691_v37, %v4889_v41 }
 0x23c   : > { %3401 = vmatprep.subr.bf16.mxu0 %v3400_v57  ;;  %804 = vmatprep.subr.mxu1 %v4889_v41  ;;  %v3412_v10 = vpack.c.bf16 %v958_v62, %v954_v23  ;;  %v953_v54 = vsel %vm950_vm11, %v3675_v4, %v3676_v26  ;;  %v952_v58 = vsel %vm950_vm11, %v3651_v3, %v3675_v4  ;;  %v3680_v5 = vunpack.i.l.bf16 %v4635_v61 }
 0x23d   : > { %3403 = vmatpush1.bf16.msra.mxu0 %v3402_v40  ;;  %v945_v59 = vpop.permute.xlu1 %944  ;;  %3973 = vrot.lane.b32.xlu0 %v3942_v38, %s4116_s21  ;;  %v955_v38 = vsel %vm950_vm11, %v3801_v2, %v3816_v56  ;;  %v3414_v1 = vpack.c.bf16 %v957_v44, %v953_v54  ;;  %v701_v35 = vsel %vm694_vm6, %v4879_v6, %v689_v39  ;;  %v3681_v56 = vunpack.i.h.bf16 %v4635_v61  ;;  %v3353_v44 = vld [vmem:[%s5535_s6 + $0x10] sm:$0xff] }
 0x23e   : > { %727 = vmatprep.subr.mxu0 %v702_v34  ;;  %2571 = vrot.lane.b32.xlu1 %v4847_v11, %s4116_s21  ;;  %v3408_v41 = vpack.c.bf16 %v956_v45, %v952_v58  ;;  %v951_v37 = vsel %vm950_vm11, %v3650_v28, %v3651_v3  ;;  %v3686_v61 = vunpack.i.h.bf16 %v4645_v32  ;;  %v3685_v60 = vunpack.i.l.bf16 %v4645_v32  ;;  %v3997_v32 = vld [vmem:[#allocation4 + $0x4] sm:$0xff] }
 0x23f   : > { %805 = vmatpush1.msra.mxu1 %v703_v43  ;;  %v947_v42 = vpop.permute.xlu0 %946  ;;  %v3410_v6 = vpack.c.bf16 %v955_v38, %v951_v37  ;;  %v5642_v57 = vmov 0.0   ;;  %v1172_v40 = vsel %vm1170_vm15, %v3680_v5, %v3681_v56  ;;  %v959_v28 = vsel %vm950_vm11, %v4870_v25, %v4923_v13  ;;  %v3341_v25 = vld [vmem:[%s5532_s3 + $0x10] sm:$0xff]  ;;  %v3383_v58 = vld [vmem:[%s5535_s6 + $0x20] sm:$0xff] }
 0x240   : > { %3413 = vmatprep.subr.bf16.mxu1 %v3412_v10  ;;  %3339 = vmatmul.mubr.msk.f32.vlgmr.msra.gmra.mrb[8].mxu1 %vm716_vm13, %v668_v55  ;;  %v962_v26 = vsel %vm950_vm11, %v947_v42, %v4900_v51  ;;  %v960_v51 = vsel %vm950_vm11, %v4923_v13, %v945_v59  ;;  %v961_v49 = vsel %vm950_vm11, %v945_v59, %v947_v42 }
 0x241   : > { %728 = vmatpush1.msra.mxu0 %v701_v35  ;;  %v4949_v11 = vpop.permute.xlu1 %1164  ;;  %3983 = vrot.lane.b32.xlu0 %v4898_v50, %s4116_s21  ;;  %v1171_v59 = vsel %vm1170_vm15, %v3685_v60, %v3680_v5  ;;  %v1173_v34 = vsel %vm1170_vm15, %v3681_v56, %v3686_v61  ;;  %v3347_v56 = vld [vmem:[%s5532_s3 + $0x20] sm:$0xff] }
 0x242   : > { %3409 = vmatprep.subr.bf16.mxu0 %v3408_v41  ;;  %3415 = vmatpush1.bf16.msra.mxu1 %v3414_v1  ;;  %v3342_v1 = vld [vmem:[%s5532_s3 + $0x18] sm:$0xff] }
 0x243   : > { %2994 = vrot.lane.b32.xlu1 %v4413_v46, %s4117_s19  ;;  %3337 = vmatmul.mubr.msk.f32.vlgmr.msra.gmra.mrb[8].mxu0 %vm716_vm13, %v668_v55  ;;  %v3824_v27 = vpop.permute.xlu0 %3823  ;;  %v669_v46 = vld [vmem:[%s5532_s3 + $0x8] sm:$0xff] }
 0x244   : > { %3411 = vmatpush1.bf16.msra.mxu0 %v3410_v6  ;;  %1062 = vmatprep.subr.mxu1 %v962_v26  ;;  %v3826_v50 = vunpack.i.h.bf16 %v3824_v27  ;;  %v3825_v39 = vunpack.i.l.bf16 %v3824_v27  ;;  %v3998_v55 = vld [vmem:[#allocation4 + $0xc] sm:$0xff] }
 0x245   : > { %985 = vmatprep.subr.mxu0 %v960_v51  ;;  %2575 = vrot.lane.b32.xlu0 %v4857_v52, %s4116_s21  ;;  %v1163_v4 = vpop.permute.xlu1 %1162  ;;  %v3384_v27 = vld [vmem:[%s5535_s6 + $0x28] sm:$0xff]  ;;  %s3228_s21 = scalar_lea.sflag [#allocation7], %s4271_s13 }
 0x246   : > { %793 = vmatprep.mubr.f32.mxu0 %v5642_v57  ;;  %870 = vmatprep.mubr.f32.mxu1 %v5642_v57  ;;  %v1175_v62 = vsel %vm1170_vm15, %v3825_v39, %v3826_v50  ;;  %v1177_v26 = vsel %vm1170_vm15, %v1163_v4, %v4949_v11 }
 0x247   : > { %1063 = vmatpush1.msra.mxu1 %v961_v49  ;;  %2992 = vrot.lane.b32.xlu1 %v3997_v32, %s4117_s19  ;;  %v3829_v52 = vpop.permute.xlu0 %3828  ;;  %v3416_v3 = vpack.c.bf16 %v1175_v62, %v1172_v40 }
 0x248   : > { %3338 = vmatmul.mubr.msk.f32.gmra.mrb[10].mxu0 %vm716_vm13, %v669_v46  ;;  %3340 = vmatmul.mubr.msk.f32.gmra.mrb[10].mxu1 %vm716_vm13, %v669_v46  ;;  %v3831_v23 = vunpack.i.h.bf16 %v3829_v52  ;;  %v3830_v2 = vunpack.i.l.bf16 %v3829_v52 }
 0x249   : > { %986 = vmatpush1.msra.mxu0 %v959_v28  ;;  %2996 = vrot.lane.b32.xlu0 %v3998_v55, %s4117_s19  ;;  %v4993_v42 = vpop.permute.xlu1 %2070  ;;  %v3761_v55 = vunpack.i.h.bf16 %v4768_v20 }
 0x24a   : > { %v3420_v13 = vpack.c.bf16 %v3831_v23, %v3686_v61  ;;  %v1174_v45 = vsel %vm1170_vm15, %v3830_v2, %v3825_v39  ;;  %v1176_v43 = vsel %vm1170_vm15, %v3826_v50, %v3831_v23  ;;  %1045 = vmatprep.mubr.f32.mxu0 %v5642_v57  ;;  %1122 = vmatprep.mubr.f32.mxu1 %v5642_v57  ;;  %v3706_v61 = vunpack.i.h.bf16 %v4668_v63 }
 0x24b   : > { %v3418_v10 = vpack.c.bf16 %v1174_v45, %v1171_v59  ;;  %v3422_v54 = vpack.c.bf16 %v1176_v43, %v1173_v34  ;;  %3417 = vmatprep.subr.bf16.mxu0 %v3416_v3  ;;  %1414 = vperm.xlu1 %3636, %v3353_v44   ;;  %v1167_v38 = vpop.permute.xlu0 %1166  ;;  %v3760_v2 = vunpack.i.l.bf16 %v4768_v20  ;;  %v3705_v34 = vunpack.i.l.bf16 %v4668_v63 }
 0x24c   : > { %3343 = vmatmul.mubr.msk.f32.vlgmr.msra.gmra.mrb[8].mxu0 %vm716_vm13, %v3341_v25  ;;  %3345 = vmatmul.mubr.msk.f32.vlgmr.msra.gmra.mrb[8].mxu1 %vm716_vm13, %v3341_v25  ;;  %v1178_v35 = vsel %vm1170_vm15, %v4949_v11, %v1167_v38  ;;  %v1179_v5 = vsel %vm1170_vm15, %v1167_v38, %v4887_v36  ;;  %v3710_v25 = vunpack.i.l.bf16 %v4675_v15 }
 0x24d   : > { %3421 = vmatprep.subr.bf16.mxu1 %v3420_v13  ;;  %2998 = vrot.lane.b32.xlu0 %v4422_v48, %s4117_s19  ;;  %v3354_v48 = vld [vmem:[%s5535_s6 + $0x18] sm:$0xff]  ;;  %v1519_v13 = vsel %vm1518_vm0, %v3705_v34, %v3760_v2  ;;  %v1520_v63 = vsel %vm1518_vm0, %v3760_v2, %v3761_v55  ;;  %v3765_v2 = vunpack.i.l.bf16 %v4773_v14  ;;  %s3241_s19 = sshll.u32 %s4280_s26, 4  ;;  %s5480_s19 = int_to_ptr.vmem [resolvable:$true] %s3241_s19 }
 0x24e   : > { %1051 = vmatprep.mubr.f32.mxu0 %v5642_v57  ;;  %1128 = vmatprep.mubr.f32.mxu1 %v5642_v57  ;;  %s4030_s15 = scalar_lea.vmem %s5480_s19, 1024  ;;  %p4037_p10 = scmp.lt.s32.totalorder %s5480_s19, %s4035_s23 }
 0x24f   : > { %3419 = vmatpush1.bf16.msra.mxu0 %v3418_v10  ;;  %3423 = vmatpush1.bf16.msra.mxu1 %v3422_v54  ;;  %v5009_v41 = vpop.permute.xlu0 %1516  ;;  %p4031_p6 = scmp.ne.s32.totalorder %s5480_s19, %s4030_s15  ;;  %p4038_p2 = scmp.lt.s32.totalorder %s4036_s24, %s4030_s15 }
 0x250   : > { %3023 = vperm.xlu1 %3636, %v3383_v58   ;;  %3344 = vmatmul.mubr.msk.f32.gmra.mrb[10].mxu0 %vm716_vm13, %v3342_v1  ;;  %v5015_v37 = vpop.permute.xlu1 %3843 }
 0x251   : > { %3346 = vmatmul.mubr.msk.f32.gmra.mrb[10].mxu1 %vm716_vm13, %v3342_v1  ;;  %1202 = vmatprep.subr.mxu0 %v1178_v35  ;;  %v1521_v1 = vsel %vm1518_vm0, %v3761_v55, %v3706_v61  ;;  %v3846_v20 = vunpack.i.h.bf16 %v5015_v37  ;;  %p4032_p13 = pnand %p4031_p6, %p5699_p12  ;;  %p4039_p4 = por %p4038_p2, %p4037_p10 }
 0x252   : > { %1279 = vmatprep.subr.mxu1 %v4887_v36  ;;  %1419 = vperm.xlu0 %3635, %v3354_v48   ;;  %v3348_v36 = vld [vmem:[%s5532_s3 + $0x28] sm:$0xff] }
 0x253   : > { %1203 = vmatpush1.msra.mxu0 %v1177_v26  ;;  %1262 = vmatprep.mubr.f32.mxu0 %v5642_v57  ;;  %v5027_v6 = vpop.permute.xlu0 %1764  ;;  %p4033_p7 = pneg %p4032_p13 }
 0x254   : > { %1280 = vmatpush1.msra.mxu1 %v1179_v5  ;;  %1339 = vmatprep.mubr.f32.mxu1 %v5642_v57  ;;  %v5033_v11 = vpop.permute.xlu1 %1510 }
 0x255   : > { %3349 = vmatmul.mubr.msk.f32.vlgmr.msra.gmra.mrb[8].mxu0 %vm716_vm13, %v3347_v56  ;;  %3351 = vmatmul.mubr.msk.f32.vlgmr.msra.gmra.mrb[8].mxu1 %vm716_vm13, %v3347_v56  ;;  %p4040_p5 = pnand %p4039_p4, %p4033_p7 }
 0x256   : > { %3028 = vperm.xlu0 %3635, %v3384_v27   ;;  %1268 = vmatprep.mubr.f32.mxu0 %v5642_v57  ;;  %v3845_v27 = vunpack.i.l.bf16 %v5015_v37 }
 0x257   : > { %1345 = vmatprep.mubr.f32.mxu1 %v5642_v57  ;;  %v5042_v50 = vpop.permute.xlu0 %3833 }
 0x258   : > { %v5044_v39 = vpop.permute.xlu1 %3858 }
 0x259   : > { %3350 = vmatmul.mubr.msk.f32.gmra.mrb[10].mxu0 %vm716_vm13, %v3348_v36  ;;  %3352 = vmatmul.mubr.msk.f32.gmra.mrb[10].mxu1 %vm716_vm13, %v3348_v36  ;;  %vm1766_vm13 = vcmask 179200  }
 0x25a   : > { %1702 = vmatprep.mubr.f32.mxu1 %v5642_v57  ;;  %1625 = vmatprep.mubr.f32.mxu0 %v5642_v57 }
 0x25b   : > { %v3839_v51 = vpop.permute.xlu0 %3838 }
 0x25c   : > { %v3841_v60 = vunpack.i.h.bf16 %v3839_v51  ;;  %v5051_v46 = vpop.permute.xlu1 %1758  ;;  %v3840_v43 = vunpack.i.l.bf16 %v3839_v51 }
 0x25e   : > { %v3432_v49 = vpack.c.bf16 %v3841_v60, %v3706_v61 }
 0x25f   : > { %v3849_v4 = vpop.permute.xlu0 %3848 }
 0x260   : > { %v5053_v40 = vpop.permute.xlu1 %3868  ;;  %3433 = vmatprep.subr.bf16.mxu1 %v3432_v49  ;;  %v3851_v10 = vunpack.i.h.bf16 %v3849_v4  ;;  %v3850_v61 = vunpack.i.l.bf16 %v3849_v4 }
 0x263   : > { %v5055_v62 = vpop.permute.xlu0 %3853 }
 0x264   : > { %v5057_v32 = vpop.permute.xlu1 %2330 }
 0x265   : > { %5643 = vst [vmem:[#allocation53_spill] sm:$0xff] %v5057_v32 }
 0x267   : > { %v5059_v52 = vpop.permute.xlu0 %3863 }
 0x268   : > { %v3879_v3 = vpop.permute.xlu1 %3878 }
 0x269   : > { %v3881_v35 = vunpack.i.h.bf16 %v3879_v3  ;;  %v3880_v48 = vunpack.i.l.bf16 %v3879_v3 }
 0x26b   : > { %v5061_v28 = vpop.permute.xlu0 %2078  ;;  %v1525_v55 = vsel %vm1518_vm0, %v3845_v27, %v3880_v48  ;;  %v1526_v37 = vsel %vm1518_vm0, %v3880_v48, %v3881_v35  ;;  %v3770_v48 = vunpack.i.l.bf16 %v4785_v53 }
 0x26c   : > { %v5063_v23 = vpop.permute.xlu1 %1512 }
 0x26f   : > { %v5066_v44 = vpop.permute.xlu0 %2577 }
 0x270   : > { %5644 = vst [vmem:[#allocation54_spill] sm:$0xff] %v5066_v44  ;;  %v5068_v59 = vpop.permute.xlu1 %3893 }
 0x273   : > { %v3874_v45 = vpop.permute.xlu0 %3873 }
 0x274   : > { %v3876_v54 = vunpack.i.h.bf16 %v3874_v45  ;;  %v3875_v38 = vunpack.i.l.bf16 %v3874_v45  ;;  %v5074_v58 = vpop.permute.xlu1 %1760  ;;  %v3436_v45 = vpack.c.bf16 %v3851_v10, %v3846_v20 }
 0x276   : > { %v1522_v26 = vsel %vm1518_vm0, %v3840_v43, %v3875_v38  ;;  %v1524_v56 = vsel %vm1518_vm0, %v3876_v54, %v3841_v60  ;;  %v1523_v5 = vsel %vm1518_vm0, %v3875_v38, %v3876_v54  ;;  %v1527_v60 = vsel %vm1518_vm0, %v3881_v35, %v3846_v20 }
 0x277   : > { %v3426_v36 = vpack.c.bf16 %v1522_v26, %v1519_v13  ;;  %v3434_v51 = vpack.c.bf16 %v1524_v56, %v1521_v1  ;;  %v3884_v49 = vpop.permute.xlu0 %3883  ;;  %v3424_v34 = vpack.c.bf16 %v1523_v5, %v1520_v63  ;;  %v3766_v13 = vunpack.i.h.bf16 %v4773_v14 }
 0x278   : > { %v3886_v44 = vunpack.i.h.bf16 %v3884_v49  ;;  %v3885_v3 = vunpack.i.l.bf16 %v3884_v49  ;;  %v5083_v32 = vpop.permute.xlu1 %3903  ;;  %v3856_v38 = vunpack.i.h.bf16 %v5055_v62  ;;  %v3711_v56 = vunpack.i.h.bf16 %v4675_v15 }
 0x279   : > { %3425 = vmatprep.subr.bf16.mxu0 %v3424_v34  ;;  %3435 = vmatpush1.bf16.msra.mxu1 %v3434_v51  ;;  %v1767_v14 = vsel %vm1766_vm13, %v3710_v25, %v3765_v2  ;;  %v1768_v35 = vsel %vm1766_vm13, %v3765_v2, %v3766_v13  ;;  %v3855_v15 = vunpack.i.l.bf16 %v5055_v62  ;;  %v3866_v25 = vunpack.i.h.bf16 %v5059_v52 }
 0x27a   : > { %v1528_v43 = vsel %vm1518_vm0, %v3850_v61, %v3885_v3  ;;  %v1530_v4 = vsel %vm1518_vm0, %v3886_v44, %v3851_v10  ;;  %3427 = vmatpush1.bf16.msra.mxu0 %v3426_v36  ;;  %3437 = vmatprep.subr.bf16.mxu1 %v3436_v45  ;;  %v1529_v54 = vsel %vm1518_vm0, %v3885_v3, %v3886_v44  ;;  %v1476_v61 = vld [vmem:[%s5533_s4] sm:$0xff]  ;;  %v3861_v3 = vunpack.i.h.bf16 %v5044_v39 }
 0x27b   : > { %v3430_v1 = vpack.c.bf16 %v1528_v43, %v1525_v55  ;;  %v3438_v63 = vpack.c.bf16 %v1530_v4, %v1527_v60  ;;  %v1515_v26 = vpop.permute.xlu0 %1514  ;;  %v3428_v20 = vpack.c.bf16 %v1529_v54, %v1526_v37  ;;  %v1769_v10 = vsel %vm1766_vm13, %v3766_v13, %v3711_v56 }
 0x27c   : > { %v5095_v5 = vpop.permute.xlu1 %3918  ;;  %v1532_v44 = vsel %vm1518_vm0, %v5063_v23, %v1515_v26  ;;  %v3448_v27 = vpack.c.bf16 %v3856_v38, %v3711_v56  ;;  %v1533_v51 = vsel %vm1518_vm0, %v1515_v26, %v5009_v41  ;;  %v1531_v62 = vsel %vm1518_vm0, %v5033_v11, %v5063_v23  ;;  %v1477_v26 = vld [vmem:[%s5533_s4 + $0x8] sm:$0xff] }
 0x27d   : > { %3429 = vmatprep.subr.bf16.mxu0 %v3428_v20  ;;  %3439 = vmatpush1.bf16.msra.mxu1 %v3438_v63  ;;  %v3896_v2 = vunpack.i.h.bf16 %v5068_v59  ;;  %v3895_v55 = vunpack.i.l.bf16 %v5068_v59  ;;  %v3871_v43 = vunpack.i.h.bf16 %v5053_v40  ;;  %v3452_v59 = vpack.c.bf16 %v3866_v25, %v3861_v3 }
 0x27e   : > { %3431 = vmatpush1.bf16.msra.mxu0 %v3430_v1  ;;  %1646 = vmatprep.subr.mxu1 %v5009_v41  ;;  %v3860_v41 = vunpack.i.l.bf16 %v5044_v39  ;;  %v3865_v39 = vunpack.i.l.bf16 %v5059_v52  ;;  %vm2872_vm0 = vcmask 162816  }
 0x27f   : > { %v3889_v36 = vpop.permute.xlu0 %3888  ;;  %1569 = vmatprep.subr.mxu0 %v1532_v44  ;;  %v1775_v56 = vsel %vm1766_vm13, %v3896_v2, %v3861_v3  ;;  %v1774_v52 = vsel %vm1766_vm13, %v3895_v55, %v3896_v2 }
 0x280   : > { %v3891_v49 = vunpack.i.h.bf16 %v3889_v36  ;;  %v3890_v34 = vunpack.i.l.bf16 %v3889_v36  ;;  %v5108_v45 = vpop.permute.xlu1 %3928  ;;  %v1773_v20 = vsel %vm1766_vm13, %v3860_v41, %v3895_v55  ;;  %v3921_v41 = vunpack.i.h.bf16 %v5095_v5 }
 0x281   : > { %1647 = vmatpush1.msra.mxu1 %v1533_v51  ;;  %v3930_v3 = vunpack.i.l.bf16 %v5108_v45 }
 0x282   : > { %v1770_v60 = vsel %vm1766_vm13, %v3855_v15, %v3890_v34  ;;  %v1772_v37 = vsel %vm1766_vm13, %v3891_v49, %v3856_v38  ;;  %1570 = vmatpush1.msra.mxu0 %v1531_v62  ;;  %3449 = vmatprep.subr.bf16.mxu1 %v3448_v27  ;;  %v1771_v13 = vsel %vm1766_vm13, %v3890_v34, %v3891_v49  ;;  %v3870_v15 = vunpack.i.l.bf16 %v5053_v40 }
 0x283   : > { %v3442_v4 = vpack.c.bf16 %v1770_v60, %v1767_v14  ;;  %v3450_v54 = vpack.c.bf16 %v1772_v37, %v1769_v10  ;;  %v3899_v11 = vpop.permute.xlu0 %3898  ;;  %3357 = vmatmul.mubr.msk.f32.vlgmr.msra.gmra.mrb[12].mxu1 %vm1554_vm12, %v1476_v61  ;;  %v3440_v23 = vpack.c.bf16 %v1771_v13, %v1768_v35  ;;  %3355 = vmatmul.mubr.msk.f32.vlgmr.msra.gmra.mrb[12].mxu0 %vm1554_vm12, %v1476_v61  ;;  %v3905_v14 = vunpack.i.l.bf16 %v5083_v32 }
 0x284   : > { %v3901_v1 = vunpack.i.h.bf16 %v3899_v11  ;;  %v3900_v63 = vunpack.i.l.bf16 %v3899_v11  ;;  %v5127_v38 = vpop.permute.xlu1 %2072  ;;  %1631 = vmatprep.mubr.f32.mxu0 %v5642_v57  ;;  %1708 = vmatprep.mubr.f32.mxu1 %v5642_v57  ;;  %v3906_v10 = vunpack.i.h.bf16 %v5083_v32  ;;  %v3776_v32 = vunpack.i.h.bf16 %v4698_v21 }
 0x285   : > { %3441 = vmatprep.subr.bf16.mxu0 %v3440_v23  ;;  %3451 = vmatpush1.bf16.msra.mxu1 %v3450_v54  ;;  %v3931_v40 = vunpack.i.h.bf16 %v5108_v45  ;;  %v2081_v55 = vsel %vm2080_vm2, %v3870_v15, %v3770_v48  ;;  %v5645_v37 = vunpack.i.h.bf16 %v4785_v53  ;;  %v3920_v13 = vunpack.i.l.bf16 %v5095_v5  ;;  %v3359_v23 = vld [vmem:[%s5533_s4 + $0x10] sm:$0xff] }
 0x286   : > { %v1776_v44 = vsel %vm1766_vm13, %v3865_v39, %v3900_v63  ;;  %v1778_v35 = vsel %vm1766_vm13, %v3901_v1, %v3866_v25  ;;  %3443 = vmatpush1.bf16.msra.mxu0 %v3442_v4  ;;  %3453 = vmatprep.subr.bf16.mxu1 %v3452_v59  ;;  %v1777_v27 = vsel %vm1766_vm13, %v3900_v63, %v3901_v1  ;;  %v5646_v5 = vunpack.i.l.bf16 %v4698_v21 }
 0x287   : > { %v3446_v36 = vpack.c.bf16 %v1776_v44, %v1773_v20  ;;  %v3454_v51 = vpack.c.bf16 %v1778_v35, %v1775_v56  ;;  %v1763_v49 = vpop.permute.xlu0 %1762  ;;  %v3444_v34 = vpack.c.bf16 %v1777_v27, %v1774_v52  ;;  %3356 = vmatmul.mubr.msk.f32.gmra.mrb[14].mxu0 %vm1554_vm12, %v1477_v26  ;;  %3358 = vmatmul.mubr.msk.f32.gmra.mrb[14].mxu1 %vm1554_vm12, %v1477_v26  ;;  %v3360_v56 = vld [vmem:[%s5533_s4 + $0x18] sm:$0xff]  ;;  %v3836_v44 = vunpack.i.h.bf16 %v5042_v50 }
 0x288   : > { %v5145_v61 = vpop.permute.xlu1 %2076  ;;  %1872 = vmatprep.mubr.f32.mxu0 %v5642_v57  ;;  %1949 = vmatprep.mubr.f32.mxu1 %v5642_v57  ;;  %v2085_v25 = vsel %vm2080_vm2, %v3871_v43, %v3905_v14  ;;  %v1780_v62 = vsel %vm1766_vm13, %v5074_v58, %v1763_v49  ;;  %v2086_v2 = vsel %vm2080_vm2, %v3905_v14, %v3906_v10  ;;  %v3835_v35 = vunpack.i.l.bf16 %v5042_v50 }
 0x289   : > { %3445 = vmatprep.subr.bf16.mxu0 %v3444_v34  ;;  %3455 = vmatpush1.bf16.msra.mxu1 %v3454_v51  ;;  %v2082_v45 = vsel %vm2080_vm2, %v3770_v48, %v5645_v37  ;;  %v1781_v43 = vsel %vm1766_vm13, %v1763_v49, %v5027_v6  ;;  %v1779_v59 = vsel %vm1766_vm13, %v5051_v46, %v5074_v58 }
 0x28a   : > { %3447 = vmatpush1.bf16.msra.mxu0 %v3446_v36  ;;  %1893 = vmatprep.subr.mxu1 %v5027_v6  ;;  %v3458_v53 = vpack.c.bf16 %v2085_v25, %v2081_v55  ;;  %v3456_v48 = vpack.c.bf16 %v2086_v2, %v2082_v45  ;;  %v2084_v39 = vsel %vm2080_vm2, %v5646_v5, %v3776_v32 }
 0x28b   : > { %v3909_v60 = vpop.permute.xlu0 %3908  ;;  %1816 = vmatprep.subr.mxu0 %v1780_v62  ;;  %v2096_v63 = vsel %vm2080_vm2, %v3930_v3, %v3931_v40  ;;  %v2092_v21 = vsel %vm2080_vm2, %v3920_v13, %v3921_v41  ;;  %v2854_v51 = vsel %vm694_vm6, %v4510_v7, %v4514_v8  ;;  %v5207_v49 = vsel %vm694_vm6, %v4514_v8, %v4522_v16 }
 0x28c   : > { %v3911_v4 = vunpack.i.h.bf16 %v3909_v60  ;;  %v3910_v54 = vunpack.i.l.bf16 %v3909_v60  ;;  %v5169_v11 = vpop.permute.xlu1 %3938  ;;  %v3468_v52 = vpack.c.bf16 %v2096_v63, %v2092_v21  ;;  %v2853_v62 = vsel %vm694_vm6, %v4517_v9, %v4510_v7 }
 0x28d   : > { %1894 = vmatpush1.msra.mxu1 %v1781_v43  ;;  %v3941_v60 = vunpack.i.h.bf16 %v5169_v11  ;;  %v2860_v7 = vmax.f32 %v4349_v29, %v2853_v62  ;;  %v2861_v9 = vmax.f32 %v4353_v30, %v2854_v51  ;;  %v2862_v43 = vmax.f32 %v4357_v31, %v5207_v49  ;;  %v3365_v31 = vld [vmem:[%s5533_s4 + $0x20] sm:$0xff] }
 0x28e   : > { %v2087_v6 = vsel %vm2080_vm2, %v3906_v10, %v3910_v54  ;;  %1817 = vmatpush1.msra.mxu0 %v1779_v59  ;;  %v2088_v1 = vsel %vm2080_vm2, %v3910_v54, %v3911_v4  ;;  %3363 = vmatmul.mubr.msk.f32.vlgmr.msra.gmra.mrb[12].mxu1 %vm1554_vm12, %v3359_v23  ;;  %vm2892_vm6 = vcmask 154624   ;;  %v2874_v4 = vsel %vm2872_vm0, %v4525_v17, %v4531_v18 }
 0x28f   : > { %v3466_v26 = vpack.c.bf16 %v2087_v6, %v4800_v24  ;;  %v3914_v20 = vpop.permute.xlu0 %3913  ;;  %3457 = vmatprep.subr.bf16.mxu0 %v3456_v48  ;;  %3361 = vmatmul.mubr.msk.f32.vlgmr.msra.gmra.mrb[12].mxu0 %vm1554_vm12, %v3359_v23  ;;  %v3464_v46 = vpack.c.bf16 %v2088_v1, %v2084_v39  ;;  %v2097_v48 = vsel %vm2080_vm2, %v4993_v42, %v5127_v38  ;;  %v5650_v42 = vld [vmem:[#allocation52_spill] sm:$0xff] }
 0x290   : > { %v5186_v58 = vpop.permute.xlu1 %3948  ;;  %3459 = vmatpush1.bf16.msra.mxu0 %v3458_v53  ;;  %1955 = vmatprep.mubr.f32.mxu1 %v5642_v57  ;;  %v3916_v14 = vunpack.i.h.bf16 %v3914_v20  ;;  %v3915_v24 = vunpack.i.l.bf16 %v3914_v20 }
 0x291   : > { %3465 = vmatprep.subr.bf16.mxu1 %v3464_v46  ;;  %1878 = vmatprep.mubr.f32.mxu0 %v5642_v57  ;;  %v3951_v5 = vunpack.i.h.bf16 %v5186_v58  ;;  %v3950_v6 = vunpack.i.l.bf16 %v5186_v58  ;;  %v2881_v46 = vmax.f32 %v2861_v9, %v2874_v4 }
 0x292   : > { %3467 = vmatpush1.bf16.msra.mxu1 %v3466_v26  ;;  %v2091_v34 = vsel %vm2080_vm2, %v3916_v14, %v3920_v13  ;;  %v2089_v50 = vsel %vm2080_vm2, %v3835_v35, %v3915_v24  ;;  %v2090_v41 = vsel %vm2080_vm2, %v3915_v24, %v3916_v14  ;;  %v2100_v13 = vsel %vm2080_vm2, %v5145_v61, %v5061_v28  ;;  %v3366_v14 = vld [vmem:[%s5533_s4 + $0x28] sm:$0xff] }
 0x293   : > { %v3924_v10 = vpop.permute.xlu0 %3923  ;;  %3469 = vmatprep.subr.bf16.mxu1 %v3468_v52  ;;  %3364 = vmatmul.mubr.msk.f32.gmra.mrb[14].mxu1 %vm1554_vm12, %v3360_v56  ;;  %v5647_v28 = vunpack.i.h.bf16 %v4712_v47  ;;  %v5648_v47 = vunpack.i.h.bf16 %v4806_v0  ;;  %v5651_v52 = vld [vmem:[#allocation27_spill] sm:$0xff]  ;;  %v2343_v51 = vsel %vm2332_vm5, %v3950_v6, %v3951_v5 }
 0x294   : > { %v3926_v27 = vunpack.i.h.bf16 %v3924_v10  ;;  %v3925_v15 = vunpack.i.l.bf16 %v3924_v10  ;;  %v5197_v36 = vpop.permute.xlu1 %3958  ;;  %3362 = vmatmul.mubr.msk.f32.gmra.mrb[14].mxu0 %vm1554_vm12, %v3360_v56  ;;  %2268 = vmatprep.mubr.f32.mxu1 %v5642_v57  ;;  %v5653_v10 = vld [vmem:[#allocation28_spill] sm:$0xff] }
 0x295   : > { %2191 = vmatprep.mubr.f32.mxu0 %v5642_v57  ;;  %v3480_v54 = vpack.c.bf16 %v3941_v60, %v5647_v28  ;;  %v3960_v35 = vunpack.i.l.bf16 %v5197_v36  ;;  %v5657_v28 = vld [vmem:[#allocation35_spill] sm:$0xff] }
 0x296   : > { %v2095_v32 = vsel %vm2080_vm2, %v3926_v27, %v3930_v3  ;;  %v2093_v25 = vsel %vm2080_vm2, %v3836_v44, %v3925_v15  ;;  %v2094_v40 = vsel %vm2080_vm2, %v3925_v15, %v3926_v27  ;;  %v2863_v3 = vmax.f32 %v4368_v33, %v4522_v16 }
 0x297   : > { %v3462_v2 = vpack.c.bf16 %v2093_v25, %v2089_v50  ;;  %v3470_v55 = vpack.c.bf16 %v2095_v32, %v2091_v34  ;;  %v2075_v8 = vpop.permute.xlu0 %2074  ;;  %v3460_v45 = vpack.c.bf16 %v2094_v40, %v2090_v41  ;;  %v2875_v33 = vsel %vm2872_vm0, %v4531_v18, %v4542_v22  ;;  %v5654_v50 = vld [vmem:[#allocation30_spill] sm:$0xff]  ;;  %v5656_v41 = vld [vmem:[#allocation31_spill] sm:$0xff] }
 0x298   : > { %v5220_v37 = vpop.permute.xlu1 %2328  ;;  %v3940_v16 = vunpack.i.l.bf16 %v5169_v11  ;;  %v2098_v30 = vsel %vm2080_vm2, %v5127_v38, %v2075_v8  ;;  %v2099_v23 = vsel %vm2080_vm2, %v2075_v8, %v5145_v61  ;;  %v2873_v11 = vsel %vm2872_vm0, %v4535_v19, %v4525_v17 }
 0x299   : > { %3471 = vmatpush1.bf16.msra.mxu1 %v3470_v55  ;;  %3461 = vmatprep.subr.bf16.mxu0 %v3460_v45  ;;  %v5649_v61 = vunpack.i.l.bf16 %v4806_v0  ;;  %v2880_v20 = vmax.f32 %v2860_v7, %v2873_v11  ;;  %v2894_v44 = vsel %vm2892_vm6, %v5651_v52, %v5653_v10  ;;  %v3961_v27 = vunpack.i.h.bf16 %v5197_v36 }
 0x29a   : > { %2212 = vmatprep.subr.mxu1 %v2100_v13  ;;  %3463 = vmatpush1.bf16.msra.mxu0 %v3462_v2  ;;  %v5284_v49 = vmax.f32 %v2862_v43, %v2875_v33  ;;  %v5287_v34 = vmax.f32 %v2863_v3, %v4542_v22  ;;  %v2895_v32 = vsel %vm2892_vm6, %v5653_v10, %v5654_v50  ;;  %v5655_v22 = vld [vmem:[#allocation32_spill] sm:$0xff]  ;;  %vm3000_vm2 = vcmask 875520  }
 0x29b   : > { %v3934_v29 = vpop.permute.xlu0 %3933  ;;  %2135 = vmatprep.subr.mxu0 %v2098_v30  ;;  %v2334_v39 = vsel %vm2332_vm5, %v5649_v61, %v5648_v47  ;;  %v2901_v62 = vmax.f32 %v2881_v46, %v2894_v44  ;;  %v2342_v45 = vsel %vm2332_vm5, %v3960_v35, %v3950_v6  ;;  %v2344_v7 = vsel %vm2332_vm5, %v3951_v5, %v3961_v27  ;;  %v5659_v61 = vld [vmem:[#allocation53_spill] sm:$0xff]  ;;  %v5667_v10 = vld [vmem:[#allocation36_spill] sm:$0xff]  ;;  %v5668_v44 = vld [vmem:[#allocation38_spill] sm:$0xff] }
 0x29c   : > { %v3936_v59 = vunpack.i.h.bf16 %v3934_v29  ;;  %v3935_v53 = vunpack.i.l.bf16 %v3934_v29  ;;  %v5247_v18 = vpop.permute.xlu1 %3963  ;;  %v2902_v11 = vmax.f32 %v5284_v49, %v2895_v32  ;;  %v2942_v35 = vsel %vm652_vm14, %v5668_v44, %v5667_v10 }
 0x29d   : > { %2213 = vmatpush1.msra.mxu1 %v2099_v23  ;;  %v3966_v3 = vunpack.i.h.bf16 %v5247_v18  ;;  %v3965_v13 = vunpack.i.l.bf16 %v5247_v18 }
 0x29e   : > { %v2338_v1 = vsel %vm2332_vm5, %v3936_v59, %v3941_v60  ;;  %v2336_v63 = vsel %vm2332_vm5, %v3940_v16, %v3935_v53  ;;  %3481 = vmatprep.subr.bf16.mxu1 %v3480_v54  ;;  %3369 = vmatmul.mubr.msk.f32.vlgmr.msra.gmra.mrb[12].mxu1 %vm1554_vm12, %v3365_v31  ;;  %v2337_v17 = vsel %vm2332_vm5, %v3935_v53, %v3936_v59 }
 0x29f   : > { %v3482_v19 = vpack.c.bf16 %v2338_v1, %v4826_v12  ;;  %v3474_v38 = vpack.c.bf16 %v2336_v63, %v5650_v42  ;;  %2136 = vmatpush1.msra.mxu0 %v2097_v48  ;;  %v3944_v26 = vpop.permute.xlu0 %3943  ;;  %v3472_v0 = vpack.c.bf16 %v2337_v17, %v2334_v39  ;;  %2274 = vmatprep.mubr.f32.mxu1 %v5642_v57  ;;  %v5652_v12 = vld [vmem:[#allocation29_spill] sm:$0xff]  ;;  %v5660_v17 = vld [vmem:[#allocation48_spill] sm:$0xff] }
 0x2a0   : > { %v3946_v58 = vunpack.i.h.bf16 %v3944_v26  ;;  %v3945_v21 = vunpack.i.l.bf16 %v3944_v26  ;;  %v3969_v56 = vpop.permute.xlu1 %3968  ;;  %3367 = vmatmul.mubr.msk.f32.vlgmr.msra.gmra.mrb[12].mxu0 %vm1554_vm12, %v3365_v31  ;;  %v2893_v24 = vsel %vm2892_vm6, %v5652_v12, %v5651_v52  ;;  %v2917_v60 = vsel %vm950_vm11, %v5656_v41, %v5655_v22  ;;  %v5658_v48 = vld [vmem:[#allocation33_spill] sm:$0xff]  ;;  %v5665_v52 = vld [vmem:[#allocation34_spill] sm:$0xff] }
 0x2a1   : > { %3473 = vmatprep.subr.bf16.mxu0 %v3472_v0  ;;  %3483 = vmatpush1.bf16.msra.mxu1 %v3482_v19  ;;  %v2900_v36 = vmax.f32 %v2880_v20, %v2893_v24  ;;  %v3971_v33 = vunpack.i.h.bf16 %v3969_v56  ;;  %v3970_v16 = vunpack.i.l.bf16 %v3969_v56  ;;  %v2916_v54 = vsel %vm950_vm11, %v5657_v28, %v5656_v41  ;;  %v5663_v0 = vld [vmem:[#allocation49_spill] sm:$0xff]  ;;  %v5671_v41 = vld [vmem:[#allocation39_spill] sm:$0xff] }
 0x2a2   : > { %3475 = vmatpush1.bf16.msra.mxu0 %v3474_v38  ;;  %v2340_v15 = vsel %vm2332_vm5, %v3945_v21, %v3946_v58  ;;  %2197 = vmatprep.mubr.f32.mxu0 %v5642_v57  ;;  %v2903_v53 = vmax.f32 %v5287_v34, %v5654_v50  ;;  %v2584_v18 = vsel %vm2579_vm1, %v3965_v13, %v3966_v3  ;;  %v5661_v19 = vunpack.i.h.bf16 %v5660_v17  ;;  %v5666_v24 = vld [vmem:[#allocation37_spill] sm:$0xff] }
 0x2a3   : > { %v3954_v25 = vpop.permute.xlu0 %3953  ;;  %v3476_v40 = vpack.c.bf16 %v2343_v51, %v2340_v15  ;;  %3370 = vmatmul.mubr.msk.f32.gmra.mrb[14].mxu1 %vm1554_vm12, %v3366_v14  ;;  %v2918_v5 = vsel %vm950_vm11, %v5655_v22, %v5658_v48  ;;  %v2925_v47 = vmax.f32 %v2901_v62, %v2917_v60  ;;  %v2924_v39 = vmax.f32 %v2900_v36, %v2916_v54  ;;  %v5670_v51 = vld [vmem:[#allocation51_spill] sm:$0xff] }
 0x2a4   : > { %v3956_v2 = vunpack.i.h.bf16 %v3954_v25  ;;  %v3955_v55 = vunpack.i.l.bf16 %v3954_v25  ;;  %v5293_v8 = vpop.permute.xlu1 %3978  ;;  %3368 = vmatmul.mubr.msk.f32.gmra.mrb[14].mxu0 %vm1554_vm12, %v3366_v14  ;;  %2515 = vmatprep.mubr.f32.mxu1 %v5642_v57  ;;  %v2583_v6 = vsel %vm2579_vm1, %v3970_v16, %v3965_v13  ;;  %v2585_v1 = vsel %vm2579_vm1, %v3966_v3, %v3971_v33  ;;  %v3371_v14 = vld [vmem:[%s5533_s4 + $0x30] sm:$0xff]  ;;  %v3372_v22 = vld [vmem:[%s5533_s4 + $0x38] sm:$0xff] }
 0x2a5   : > { %3477 = vmatprep.subr.bf16.mxu0 %v3476_v40  ;;  %2438 = vmatprep.mubr.f32.mxu0 %v5642_v57  ;;  %v5662_v42 = vunpack.i.l.bf16 %v5660_v17  ;;  %v2347_v26 = vsel %vm2332_vm5, %v5220_v37, %v5659_v61  ;;  %v5664_v20 = vunpack.i.h.bf16 %v5663_v0  ;;  %v2919_v12 = vsel %vm950_vm11, %v5658_v48, %v5665_v52  ;;  %v5673_v3 = vld [vmem:[#allocation42_spill] sm:$0xff] }
 0x2a6   : > { %v3484_v9 = vpack.c.bf16 %v3961_v27, %v3956_v2  ;;  %v2339_v43 = vsel %vm2332_vm5, %v3955_v55, %v3945_v21  ;;  %v2341_v4 = vsel %vm2332_vm5, %v3946_v58, %v3956_v2  ;;  %v5669_v27 = vld [vmem:[#allocation50_spill] sm:$0xff]  ;;  %v3498_v49 = vpack.c.bf16 %v2585_v1, %v5670_v51 }
 0x2a7   : > { %v3478_v29 = vpack.c.bf16 %v2342_v45, %v2339_v43  ;;  %v3486_v30 = vpack.c.bf16 %v2344_v7, %v2341_v4  ;;  %v2327_v31 = vpop.permute.xlu0 %2326  ;;  %v2581_v38 = vsel %vm2579_vm1, %v5662_v42, %v5661_v19  ;;  %v3496_v46 = vpack.c.bf16 %v3971_v33, %v5664_v20  ;;  %v5672_v45 = vld [vmem:[#allocation40_spill] sm:$0xff]  ;;  %v5677_v42 = vld [vmem:[#allocation43_spill] sm:$0xff]  ;;  %v5679_v52 = vld [vmem:[#allocation54_spill] sm:$0xff] }
 0x2a8   : > { %v5310_v23 = vpop.permute.xlu1 %3988  ;;  %3485 = vmatprep.subr.bf16.mxu1 %v3484_v9  ;;  %v2346_v59 = vsel %vm2332_vm5, %v2327_v31, %v5220_v37  ;;  %v3488_v56 = vpack.c.bf16 %v2584_v18, %v2581_v38  ;;  %v2943_v37 = vsel %vm652_vm14, %v5667_v10, %v5666_v24  ;;  %v3490_v15 = vpack.c.bf16 %v2583_v6, %v5669_v27  ;;  %v5674_v9 = vld [vmem:[#allocation41_spill] sm:$0xff]  ;;  %v5676_v6 = vld [vmem:[#allocation46_spill] sm:$0xff]  ;;  %v5680_v10 = vld [vmem:[#allocation47_spill] sm:$0xff] }
 0x2a9   : > { %3479 = vmatpush1.bf16.msra.mxu0 %v3478_v29  ;;  %3487 = vmatpush1.bf16.msra.mxu1 %v3486_v30  ;;  %v3981_v34 = vunpack.i.h.bf16 %v5293_v8  ;;  %v3980_v50 = vunpack.i.l.bf16 %v5293_v8  ;;  %v2926_v32 = vmax.f32 %v2902_v11, %v2918_v5  ;;  %v2927_v40 = vmax.f32 %v2903_v53, %v2919_v12 }
 0x2aa   : > { %2382 = vmatprep.subr.mxu0 %v2346_v59  ;;  %2459 = vmatprep.subr.mxu1 %v5659_v61  ;;  %v2949_v36 = vmax.f32 %v2924_v39, %v2942_v35  ;;  %v2950_v8 = vmax.f32 %v2925_v47, %v2943_v37  ;;  %v2944_v60 = vsel %vm652_vm14, %v5666_v24, %v5671_v41  ;;  %v3990_v7 = vunpack.i.l.bf16 %v5310_v23  ;;  %v5675_v39 = vld [vmem:[#allocation44_spill] sm:$0xff] }
 0x2ab   : > { %v2325_v63 = vpop.permute.xlu0 %2324  ;;  %v2961_v13 = vsel %vm1170_vm15, %v5673_v3, %v5672_v45  ;;  %v2962_v43 = vsel %vm1170_vm15, %v5672_v45, %v5674_v9  ;;  %v3991_v4 = vunpack.i.h.bf16 %v5310_v23  ;;  %v2590_v16 = vsel %vm2579_vm1, %v3980_v50, %v3981_v34  ;;  %v3377_v35 = vld [vmem:[%s5533_s4 + $0x40] sm:$0xff] }
 0x2ac   : > { %v2345_v58 = vsel %vm2332_vm5, %v2325_v63, %v2327_v31  ;;  %v5335_v21 = vpop.permute.xlu1 %2573  ;;  %v2952_v31 = vmax.f32 %v2927_v40, %v5671_v41  ;;  %vm2980_vm14 = vcmask 883712   ;;  %v2951_v23 = vmax.f32 %v2926_v32, %v2944_v60 }
 0x2ad   : > { %2383 = vmatpush1.msra.mxu0 %v2345_v58  ;;  %2460 = vmatpush1.msra.mxu1 %v2347_v26  ;;  %v2969_v59 = vmax.f32 %v2950_v8, %v2962_v43  ;;  %v2968_v53 = vmax.f32 %v2949_v36, %v2961_v13  ;;  %v2589_v18 = vsel %vm2579_vm1, %v3990_v7, %v3980_v50  ;;  %v5678_v26 = vld [vmem:[#allocation45_spill] sm:$0xff]  ;;  %v3016_v13 = vld [vmem:[%s5534_s5] sm:$0xff]  ;;  %v5686_v43 = vld [vmem:[#allocation15_spill] sm:$0xff] }
 0x2ae   : > { %3489 = vmatprep.subr.bf16.mxu0 %v3488_v56  ;;  %3497 = vmatprep.subr.bf16.mxu1 %v3496_v46  ;;  %v2591_v48 = vsel %vm2579_vm1, %v3981_v34, %v3991_v4  ;;  %v2981_v1 = vsel %vm2980_vm14, %v5676_v6, %v5675_v39  ;;  %v2963_v38 = vsel %vm1170_vm15, %v5674_v9, %v5677_v42  ;;  %v3378_v36 = vld [vmem:[%s5533_s4 + $0x48] sm:$0xff]  ;;  %v5685_v9 = vld [vmem:[#allocation24_spill] sm:$0xff] }
 0x2af   : > { %v3974_v25 = vpop.permute.xlu0 %3973  ;;  %3373 = vmatmul.mubr.msk.f32.vlgmr.msra.gmra.mrb[12].mxu0 %vm1554_vm12, %v3371_v14  ;;  %3375 = vmatmul.mubr.msk.f32.vlgmr.msra.gmra.mrb[12].mxu1 %vm1554_vm12, %v3371_v14  ;;  %v2982_v0 = vsel %vm2980_vm14, %v5675_v39, %v5678_v26  ;;  %v2971_v58 = vmax.f32 %v2952_v31, %v5677_v42  ;;  %v2988_v56 = vmax.f32 %v2968_v53, %v2981_v1  ;;  %v3017_v7 = vld [vmem:[%s5534_s5 + $0x8] sm:$0xff]  ;;  %v5689_v31 = vld [vmem:[#allocation18_spill] sm:$0xff]  ;;  %v5691_v1 = vld [vmem:[#allocation23_spill] sm:$0xff] }
 0x2b0   : > { %v3976_v62 = vunpack.i.h.bf16 %v3974_v25  ;;  %v3975_v2 = vunpack.i.l.bf16 %v3974_v25  ;;  %3491 = vmatpush1.bf16.msra.mxu0 %v3490_v15  ;;  %3499 = vmatpush1.bf16.msra.mxu1 %v3498_v49  ;;  %v2572_v55 = vpop.permute.xlu1 %2571  ;;  %v2970_v12 = vmax.f32 %v2951_v23, %v2963_v38  ;;  %v2989_v24 = vmax.f32 %v2969_v59, %v2982_v0  ;;  %v5690_v53 = vld [vmem:[#allocation25_spill] sm:$0xff] }
 0x2b1   : > { %2444 = vmatprep.mubr.f32.mxu0 %v5642_v57  ;;  %2521 = vmatprep.mubr.f32.mxu1 %v5642_v57  ;;  %v2983_v37 = vsel %vm2980_vm14, %v5678_v26, %v5680_v10  ;;  %v2592_v27 = vsel %vm2579_vm1, %v2572_v55, %v5335_v21  ;;  %v2991_v50 = vmax.f32 %v2971_v58, %v5680_v10  ;;  %v5694_v0 = vld [vmem:[#allocation21_spill] sm:$0xff] }
 0x2b2   : > { %v2587_v33 = vsel %vm2579_vm1, %v3975_v2, %v3976_v62  ;;  %v2990_v32 = vmax.f32 %v2970_v12, %v2983_v37  ;;  %v5696_v37 = vld [vmem:[#allocation26_spill] sm:$0xff] }
 0x2b3   : > { %v3984_v29 = vpop.permute.xlu0 %3983  ;;  %v3492_v30 = vpack.c.bf16 %v2590_v16, %v2587_v33  ;;  %3374 = vmatmul.mubr.msk.f32.gmra.mrb[14].mxu0 %vm1554_vm12, %v3372_v22  ;;  %3376 = vmatmul.mubr.msk.f32.gmra.mrb[14].mxu1 %vm1554_vm12, %v3372_v22  ;;  %v5687_v33 = vld [vmem:[#allocation16_spill] sm:$0xff] }
 0x2b4   : > { %v3986_v28 = vunpack.i.h.bf16 %v3984_v29  ;;  %v3985_v54 = vunpack.i.l.bf16 %v3984_v29  ;;  %2685 = vmatprep.mubr.f32.mxu0 %v5642_v57  ;;  %2762 = vmatprep.mubr.f32.mxu1 %v5642_v57  ;;  %v560_v16 = vadd.f32 %v5687_v33, %v5685_v9  ;;  %v5688_v29 = vld [vmem:[#allocation17_spill] sm:$0xff] }
 0x2b5   : > { %v2995_v11 = vpop.permute.xlu1 %2994  ;;  %3493 = vmatprep.subr.bf16.mxu0 %v3492_v30  ;;  %v473_v30 = vadd.f32 %v5688_v29, %v5685_v9 }
 0x2b6   : > { %v3500_v5 = vpack.c.bf16 %v3991_v4, %v3986_v28  ;;  %v2586_v47 = vsel %vm2579_vm1, %v3985_v54, %v3975_v2  ;;  %v2588_v61 = vsel %vm2579_vm1, %v3976_v62, %v3986_v28  ;;  %v471_v4 = vadd.f32 %v5686_v43, %v5685_v9 }
 0x2b7   : > { %v3494_v63 = vpack.c.bf16 %v2589_v18, %v2586_v47  ;;  %v3502_v17 = vpack.c.bf16 %v2591_v48, %v2588_v61  ;;  %v2576_v19 = vpop.permute.xlu0 %2575  ;;  %v584_v59 = vmax.f32 %v560_v16, 0.0  ;;  %v583_v47 = vmax.f32 %v473_v30, 0.0 }
 0x2b8   : > { %3501 = vmatprep.subr.bf16.mxu1 %v3500_v5  ;;  %v2593_v20 = vsel %vm2579_vm1, %v5335_v21, %v2576_v19  ;;  %v2594_v15 = vsel %vm2579_vm1, %v2576_v19, %v5679_v52  ;;  %v582_v23 = vmax.f32 %v471_v4, 0.0  ;;  %v5693_v19 = vld [vmem:[#allocation20_spill] sm:$0xff] }
 0x2b9   : > { %v2993_v46 = vpop.permute.xlu1 %2992  ;;  %3495 = vmatpush1.bf16.msra.mxu0 %v3494_v63  ;;  %3503 = vmatpush1.bf16.msra.mxu1 %v3502_v17  ;;  %v5692_v63 = vld [vmem:[#allocation19_spill] sm:$0xff]  ;;  %v566_v42 = vadd.f32 %v5693_v19, %v5691_v1 }
 0x2ba   : > { %v3001_v14 = vsel %vm3000_vm2, %v2993_v46, %v2995_v11  ;;  %2629 = vmatprep.subr.mxu0 %v2593_v20  ;;  %2706 = vmatprep.subr.mxu1 %v5679_v52  ;;  %v477_v17 = vadd.f32 %v5692_v63, %v5691_v1  ;;  %v479_v20 = vadd.f32 %v5694_v0, %v5691_v1  ;;  %v5695_v46 = vld [vmem:[#allocation22_spill] sm:$0xff] }
 0x2bb   : > { %v2997_v44 = vpop.permute.xlu0 %2996  ;;  %v3008_v51 = vmax.f32 %v2988_v56, %v3001_v14  ;;  %v568_v58 = vadd.f32 %v5695_v46, %v5691_v1 }
 0x2bc   : > { %v3002_v49 = vsel %vm3000_vm2, %v2995_v11, %v2997_v44 }
 0x2bd   : > { %v3009_v34 = vmax.f32 %v2989_v24, %v3002_v49  ;;  %2630 = vmatpush1.msra.mxu0 %v2592_v27  ;;  %2707 = vmatpush1.msra.mxu1 %v2594_v15  ;;  %v3012_v2 = vsel %vm4323_vm7, %v3008_v51, 0.0  ;;  %v589_v62 = vmax.f32 %v568_v58, 0.0 }
 0x2be   : > { %3379 = vmatmul.mubr.msk.f32.vlgmr.msra.gmra.mrb[12].mxu0 %vm1554_vm12, %v3377_v35  ;;  %3381 = vmatmul.mubr.msk.f32.vlgmr.msra.gmra.mrb[12].mxu1 %vm1554_vm12, %v3377_v35 }
 0x2bf   : > { %v2999_v25 = vpop.permute.xlu0 %2998  ;;  %v3013_v21 = vsel %vm4327_vm8, %v3009_v34, 0.0  ;;  %2691 = vmatprep.mubr.f32.mxu0 %v5642_v57  ;;  %2768 = vmatprep.mubr.f32.mxu1 %v5642_v57 }
 0x2c0   : > { %v3003_v55 = vsel %vm3000_vm2, %v2997_v44, %v2999_v25  ;;  %v3011_v22 = vmax.f32 %v2991_v50, %v2999_v25  ;;  %3385 = vmatprep.subr.msk.mxu0 %vm395_vm3, %v3013_v21  ;;  %v588_v25 = vmax.f32 %v566_v42, 0.0 }
 0x2c1   : > { %v3010_v8 = vmax.f32 %v2990_v32, %v3003_v55  ;;  %3386 = vmatpush1.msk.msra.mxu0 %vm395_vm3, %v3012_v2  ;;  %v586_v32 = vmax.f32 %v477_v17, 0.0 }
 0x2c2   : > { %3380 = vmatmul.mubr.msk.f32.gmra.mrb[14].mxu0 %vm1554_vm12, %v3378_v36  ;;  %3382 = vmatmul.mubr.msk.f32.gmra.mrb[14].mxu1 %vm1554_vm12, %v3378_v36  ;;  %v3015_v60 = vsel %vm4343_vm10, %v3011_v22, 0.0  ;;  %v587_v36 = vmax.f32 %v479_v20, 0.0 }
 0x2c3   : > { %v3014_v3 = vsel %vm4331_vm9, %v3010_v8, 0.0  ;;  %3389 = vmatprep.subr.msk.mxu1 %vm395_vm3, %v3015_v60  ;;  %3113 = vmatprep.mubr.f32.mxu0 %v5642_v57 }
 0x2c4   : > { %3390 = vmatpush1.msk.msra.mxu1 %vm395_vm3, %v3014_v3  ;;  %3190 = vmatprep.mubr.f32.mxu1 %v5642_v57  ;;  %vm5697_vm3 = vcmask 130048  }
 0x2c6   : > { %3387 = vmatmul.mubr.msk.f32.vlgmr.msra.gmra.mrb[16].mxu0 %vm382_vm4, %v3016_v13  ;;  %3391 = vmatmul.mubr.msk.f32.vlgmr.msra.gmra.mrb[16].mxu1 %vm382_vm4, %v3016_v13 }
 0x2c7   : > { %3119 = vmatprep.mubr.f32.mxu0 %v5642_v57  ;;  %3196 = vmatprep.mubr.f32.mxu1 %v5642_v57  ;;  %v562_v57 = vadd.f32 %v5689_v31, %v5685_v9 }
 0x2c9   : > { %v585_v61 = vmax.f32 %v562_v57, 0.0 }
 0x2ca   : > { %3388 = vmatmul.mubr.msk.f32.gmra.mrb[18].mxu0 %vm382_vm4, %v3017_v7  ;;  %3392 = vmatmul.mubr.msk.f32.gmra.mrb[18].mxu1 %vm382_vm4, %v3017_v7  ;;  %v1415_v45 = vpop.permute.xlu1 %1414  ;;  %vm5698_vm4 = vmmov %vm5697_vm3 }
 0x2cf   : > { %v3024_v1 = vpop.permute.xlu1 %3023 }
 0x2d1   : > { %v1420_v29 = vpop.permute.xlu0 %1419 }
 0x328   : > { %v1264_v28 = vpop.f32.mrb[8].mxu0  ;;  %v1341_v54 = vpop.f32.mrb[8].mxu1 }
 0x329   : > { %v3504_v18 = vadd.f32 %v1264_v28, %v5690_v53  ;;  %v3508_v11 = vadd.f32 %v1341_v54, %v5690_v53  ;;  %v1266_v48 = vpop.f32.mrb[9].mxu0  ;;  %v1343_v5 = vpop.f32.mrb[9].mxu1 }
 0x32a   : > { %v3505_v39 = vadd.f32 %v1266_v48, %v5690_v53  ;;  %v3509_v6 = vadd.f32 %v1343_v5, %v5690_v53 }
 0x32b   : > { %v1360_v38 = vmax.f32 %v3504_v18, 0.0  ;;  %v1362_v26 = vmax.f32 %v3508_v11, 0.0 }
 0x32c   : > { %v1361_v56 = vmax.f32 %v3505_v39, 0.0  ;;  %v1363_v14 = vmax.f32 %v3509_v6, 0.0  ;;  %v1270_v52 = vpop.f32.mrb[10].mxu0  ;;  %v1347_v12 = vpop.f32.mrb[10].mxu1 }
 0x32d   : > { %v1368_v24 = vadd.f32 %v1360_v38, %v582_v23  ;;  %v1370_v10 = vadd.f32 %v1362_v26, %v584_v59  ;;  %v3506_v44 = vadd.f32 %v1270_v52, %v5696_v37  ;;  %v3510_v35 = vadd.f32 %v1347_v12, %v5696_v37  ;;  %v1272_v27 = vpop.f32.mrb[11].mxu0  ;;  %v1349_v15 = vpop.f32.mrb[11].mxu1 }
 0x32e   : > { %v1369_v51 = vadd.f32 %v1361_v56, %v583_v47  ;;  %v1371_v49 = vadd.f32 %v1363_v14, %v585_v61  ;;  %v3507_v34 = vadd.f32 %v1272_v27, %v5696_v37  ;;  %v3511_v50 = vadd.f32 %v1349_v15, %v5696_v37  ;;  %v3029_v37 = vpop.permute.xlu0 %3028 }
 0x32f   : > { %v1364_v40 = vmax.f32 %v3506_v44, 0.0  ;;  %v1366_v21 = vmax.f32 %v3510_v35, 0.0 }
 0x330   : > { %v1365_v2 = vmax.f32 %v3507_v34, 0.0  ;;  %v1367_v55 = vmax.f32 %v3511_v50, 0.0 }
 0x331   : > { %v1372_v22 = vadd.f32 %v1364_v40, %v586_v32  ;;  %v1374_v8 = vadd.f32 %v1366_v21, %v588_v25 }
 0x332   : > { %v1373_v41 = vadd.f32 %v1365_v2, %v587_v36  ;;  %v1375_v60 = vadd.f32 %v1367_v55, %v589_v62 }
 0x391   : > { %v2687_v3 = vpop.f32.mrb[12].mxu0  ;;  %v2764_v13 = vpop.f32.mrb[12].mxu1 }
 0x392   : > { %v3512_v7 = vadd.f32 %v2687_v3, %v1415_v45  ;;  %v3516_v9 = vadd.f32 %v2764_v13, %v1415_v45  ;;  %v2689_v43 = vpop.f32.mrb[13].mxu0  ;;  %v2766_v4 = vpop.f32.mrb[13].mxu1 }
 0x393   : > { %v3513_v33 = vadd.f32 %v2689_v43, %v1415_v45  ;;  %v3517_v16 = vadd.f32 %v2766_v4, %v1415_v45 }
 0x394   : > { %v2783_v30 = vmax.f32 %v3512_v7, 0.0  ;;  %v2785_v31 = vmax.f32 %v3516_v9, 0.0 }
 0x395   : > { %v2784_v57 = vmax.f32 %v3513_v33, 0.0  ;;  %v2786_v28 = vmax.f32 %v3517_v16, 0.0  ;;  %v2693_v54 = vpop.f32.mrb[14].mxu0  ;;  %v2770_v23 = vpop.f32.mrb[14].mxu1 }
 0x396   : > { %v2791_v59 = vadd.f32 %v2783_v30, %v1368_v24  ;;  %v2793_v53 = vadd.f32 %v2785_v31, %v1370_v10  ;;  %v3514_v18 = vadd.f32 %v2693_v54, %v1420_v29  ;;  %v3518_v11 = vadd.f32 %v2770_v23, %v1420_v29  ;;  %v2695_v48 = vpop.f32.mrb[15].mxu0  ;;  %v2772_v5 = vpop.f32.mrb[15].mxu1 }
 0x397   : > { %v2792_v47 = vadd.f32 %v2784_v57, %v1369_v51  ;;  %v2794_v61 = vadd.f32 %v2786_v28, %v1371_v49  ;;  %v3515_v39 = vadd.f32 %v2695_v48, %v1420_v29  ;;  %v3519_v6 = vadd.f32 %v2772_v5, %v1420_v29 }
 0x398   : > { %v2787_v63 = vmax.f32 %v3514_v18, 0.0  ;;  %v2789_v17 = vmax.f32 %v3518_v11, 0.0 }
 0x399   : > { %v2788_v19 = vmax.f32 %v3515_v39, 0.0  ;;  %v2790_v42 = vmax.f32 %v3519_v6, 0.0  ;;  %v3115_v38 = vpop.f32.mrb[16].mxu0  ;;  %v3192_v26 = vpop.f32.mrb[16].mxu1 }
 0x39a   : > { %v2795_v0 = vadd.f32 %v2787_v63, %v1372_v22  ;;  %v2797_v20 = vadd.f32 %v2789_v17, %v1374_v8  ;;  %v3116_v46 = vadd.f32 %v3115_v38, %v3024_v1  ;;  %v3193_v58 = vadd.f32 %v3192_v26, %v3024_v1  ;;  %v3117_v56 = vpop.f32.mrb[17].mxu0  ;;  %v3194_v14 = vpop.f32.mrb[17].mxu1 }
 0x39b   : > { %v2796_v52 = vadd.f32 %v2788_v19, %v1373_v41  ;;  %v2798_v12 = vadd.f32 %v2790_v42, %v1375_v60  ;;  %v3118_v24 = vadd.f32 %v3117_v56, %v3024_v1  ;;  %v3195_v10 = vadd.f32 %v3194_v14, %v3024_v1 }
 0x39c   : > { %v3203_v44 = vmax.f32 %v3116_v46, 0.0  ;;  %v3205_v35 = vmax.f32 %v3193_v58, 0.0 }
 0x39d   : > { %v3204_v27 = vmax.f32 %v3118_v24, 0.0  ;;  %v3206_v15 = vmax.f32 %v3195_v10, 0.0  ;;  %v3121_v51 = vpop.f32.mrb[18].mxu0  ;;  %v3198_v49 = vpop.f32.mrb[18].mxu1 }
 0x39e   : > { %v3211_v34 = vadd.f32 %v3203_v44, %v2791_v59  ;;  %v3213_v50 = vadd.f32 %v3205_v35, %v2793_v53  ;;  %v3122_v32 = vadd.f32 %v3121_v51, %v3029_v37  ;;  %v3199_v25 = vadd.f32 %v3198_v49, %v3029_v37  ;;  %v3123_v40 = vpop.f32.mrb[19].mxu0  ;;  %v3200_v21 = vpop.f32.mrb[19].mxu1 }
 0x39f   : > { %v3212_v36 = vadd.f32 %v3204_v27, %v2792_v47  ;;  %v3214_v62 = vadd.f32 %v3206_v15, %v2794_v61  ;;  %v3124_v2 = vadd.f32 %v3123_v40, %v3029_v37  ;;  %v3201_v55 = vadd.f32 %v3200_v21, %v3029_v37 }
 0x3a0   : > { %3219 = vst [vmem:[%s4280_s26] sm:$0xff] %v3211_v34  ;;  %3221 = vst [vmem:[%s4280_s26 + $0x10] sm:$0xff] %v3213_v50  ;;  %v3207_v22 = vmax.f32 %v3122_v32, 0.0  ;;  %v3209_v8 = vmax.f32 %v3199_v25, 0.0 }
 0x3a1   : > { %3220 = vst [vmem:[%s4280_s26 + $0x8] sm:$0xff] %v3212_v36  ;;  %3222 = vst.msk [vmem:[%s4280_s26 + $0x18] sm:$0xff] %vm5697_vm3, %v3214_v62  ;;  %v3208_v41 = vmax.f32 %v3124_v2, 0.0  ;;  %v3210_v60 = vmax.f32 %v3201_v55, 0.0 }
 0x3a2   : > { %v3215_v45 = vadd.f32 %v3207_v22, %v2795_v0  ;;  %v3217_v3 = vadd.f32 %v3209_v8, %v2797_v20 }
 0x3a3   : > { %v3216_v13 = vadd.f32 %v3208_v41, %v2796_v52  ;;  %v3218_v7 = vadd.f32 %v3210_v60, %v2798_v12 }
 0x3a4   : > { %3223 = vst [vmem:[%s4280_s26 + $0x20] sm:$0xff] %v3215_v45  ;;  %3225 = vst [vmem:[%s4280_s26 + $0x30] sm:$0xff] %v3217_v3 }
 0x3a5   : > { %3224 = vst [vmem:[%s4280_s26 + $0x28] sm:$0xff] %v3216_v13  ;;  %3226 = vst.msk [vmem:[%s4280_s26 + $0x38] sm:$0xff] %vm5698_vm4, %v3218_v7 }
 0x3a6   : > { %4043 = shalt.err (!%p4040_p5)
}
 0x3a7   : > { %s4044_s26 = scalar_lea.hbm %s5478_s25, 1024  ;;  %s4048_s12 = scalar_lea.hbm %s5537_s8, 2048 }
 0x3a8   : > { %p4045_p8 = scmp.ne.s32.totalorder %s5478_s25, %s4044_s26  ;;  %p4049_p1 = scmp.lt.u32.totalorder %s5478_s25, %s5537_s8 }
 0x3a9   : > { %p4050_p3 = scmp.lt.u32.totalorder %s4048_s12, %s4044_s26  ;;  %p4052_p6 = scmp.lt.u32.totalorder %s4044_s26, %s5478_s25 }
 0x3aa   : > { %p4046_p9 = pnand %p4045_p8, %p5699_p12 }
 0x3ab   : > { %p4051_p11 = por %p4050_p3, %p4049_p1 }
 0x3ac   : > { %p4047_p0 = pneg %p4046_p9 }
 0x3ad   : > { %p4053_p13 = por %p4052_p6, %p4051_p11 }
 0x3af   : > { %p4054_p7 = pnand %p4053_p13, %p4047_p0 }
 0x3b1   : > { %4057 = shalt.err (!%p4054_p7)
}
 0x3b2   : > { %s4119_s15 = smov 512   ;;  %s4120_s22 = smov 32  }
 0x3b3   : > { %3570 = dma.vmem_to_hbm [thread:$0]  (%p5699_p12), %s5480_s19, 1024, %s5478_s25, %s3228_s21, %s4119_s15, %s4119_s15, %s4120_s22  }
 0x3b4 PF: > { %s3256_s23 = sand.u32 1, %s4084_s27   ;;  %p5700_p10 = scmp.ne.s32.totalorder %s5585_s18, 0 }
 0x3b5   : > { %p5701_p2 = scmp.ge.s32.totalorder %s4096_s30, 2  ;;  %s3257_s24 = scalar_lea.sflag [#allocation7], %s3256_s23 }
 0x3b7   : > { %p3577_p4 = pnand %p5701_p2, %p5700_p10 }
 0x3b9   : > { %4079 = dma.done.wait (!%p3577_p4), %s3257_s24, 1024  }
 0x3ba   : > { %4081 = vsyncadd (!%p3577_p4), %s3257_s24, 4294966272  ;;  %p21_p5 = scmp.ge.s32.totalorder %s4191_s11, 4   ;;  %s5702_s27 = smov %s4088_s28 }
 0x3bb   : > { %s5703_s28 = smov %s4092_s29  ;;  %s5704_s29 = smov %s4203_s14 }
 0x3bc   : > { %s5705_s30 = smov %s4191_s11  ;;  %23 = sbr.rel (!%p21_p5) target bundleno = 5 (0x5), region = 110 }
 0x3c3   :  { %3262 = vsyncpa [#allocation6], 1 }
 0x3c4   :  { %3264 = vsyncpa [#allocation6 + $0x1], 1 }
 0x3c5   :  { %3265 = vsyncpa [#allocation7], 1 }
 0x3c6   :  { %3267 = vsyncpa [#allocation7 + $0x1], 1 }

</bundles_post_ra>
